<compile_context>
chip_gen: v6e
topology: v6e:2x2x1
jax: 0.10.0
libtpu: 0.0.40
codegen_flags: <defaults>
</compile_context>

<pallas_src>
import functools

import jax
import jax.numpy as jnp
import numpy as np
from jax.experimental import pallas as pl
from jax.experimental.pallas import tpu as pltpu

LANE = 128


def _round_up(x, m):
    return (x + m - 1) // m * m


# ----------------------------------------------------------------------------
# Fused Pallas kernel: one batch element per grid step.
# ----------------------------------------------------------------------------
def _fused_block_kernel(x_ref, w1_ref, s1_ref, b1_ref,
                        wd_ref, s2_ref, b2_ref,
                        w3_ref, s3_ref, b3_ref,
                        o_ref, hbuf,
                        *, stride, use_res, H, W, Ho, Wo):
    cin_p = x_ref.shape[-1]
    hid_p = hbuf.shape[-1]
    oup_p = o_ref.shape[-1]

    # Zero the padded scratch so its 1-px border is a valid zero halo.
    # (Cheap VMEM memset; done every step so it stays correct when the
    # "parallel" batch axis is split across TensorCores.)
    hbuf[...] = jnp.zeros_like(hbuf)

    # ---- 1) 1x1 expand conv + BN + ReLU6  (MXU: bf16 x bf16 -> f32) --------
    x_tile = x_ref[0]                                   # (H, W, cin_p), f32
    x2d = x_tile.reshape(H * W, cin_p).astype(jnp.bfloat16)
    h = jnp.dot(x2d, w1_ref[...], preferred_element_type=jnp.float32)
    h = jnp.clip(h * s1_ref[...] + b1_ref[...], 0.0, 6.0)
    hbuf[1:H + 1, 1:W + 1, :] = h.reshape(H, W, hid_p)  # interior of halo'd buf

    # ---- 2) 3x3 depthwise conv (pad=1, stride s) + BN + ReLU6 (VPU) --------
    wd = wd_ref[...]                                    # (3, 3, hid_p)
    acc = jnp.zeros((Ho, Wo, hid_p), jnp.float32)
    for ky in range(3):
        for kx in range(3):
            if stride == 1:
                win = hbuf[ky:ky + Ho, kx:kx + Wo, :]   # stride-1 offset reads
            else:
                # TODO(synk): for stride=2, split even/odd columns via reshape
                # instead of a strided slice to avoid per-tap relayouts.
                win = jax.lax.slice(
                    hbuf[...],
                    (ky, kx, 0),
                    (ky + stride * (Ho - 1) + 1,
                     kx + stride * (Wo - 1) + 1, hid_p),
                    (stride, stride, 1))
            acc = acc + win * wd[ky, kx]
    h2 = jnp.clip(acc * s2_ref[0] + b2_ref[0], 0.0, 6.0)

    # ---- 3) 1x1 project conv + BN (+ residual)  (MXU) ----------------------
    h2d = h2.reshape(Ho * Wo, hid_p).astype(jnp.bfloat16)
    y = jnp.dot(h2d, w3_ref[...], preferred_element_type=jnp.float32)
    y = y * s3_ref[...] + b3_ref[...]
    if use_res:
        # Residual read straight from the x tile already in VMEM (cin_p==oup_p).
        y = y + x_tile.reshape(H * W, cin_p)
    o_ref[0] = y.reshape(Ho, Wo, oup_p).astype(o_ref.dtype)


# ----------------------------------------------------------------------------
# InvertedResidual forward (eval-mode BN folded into scale/bias).
# ----------------------------------------------------------------------------
def fold_bn(gamma, beta, mean, var, eps=1e-5):
    scale = gamma / jnp.sqrt(var + eps)
    bias = beta - mean * scale
    return scale, bias


def make_params(key, inp, oup, expand_ratio):
    """Deterministic synthetic parameters (matching PyTorch module shapes)."""
    hid = inp * expand_ratio
    ks = jax.random.split(key, 15)
    p = {
        # 1x1 expand conv: torch (hid, inp, 1, 1) -> matmul (inp, hid)
        "w1": 0.1 * jax.random.normal(ks[0], (inp, hid), jnp.float32),
        # 3x3 depthwise conv: torch (hid, 1, 3, 3) -> (3, 3, hid)
        "wd": 0.1 * jax.random.normal(ks[1], (3, 3, hid), jnp.float32),
        # 1x1 project conv: torch (oup, hid, 1, 1) -> matmul (hid, oup)
        "w3": 0.1 * jax.random.normal(ks[2], (hid, oup), jnp.float32),
    }
    for i, c, ko in (("1", hid, 3), ("2", hid, 7), ("3", oup, 11)):
        gamma = 1.0 + 0.1 * jax.random.normal(ks[ko + 0], (c,), jnp.float32)
        beta = 0.1 * jax.random.normal(ks[ko + 1], (c,), jnp.float32)
        mean = 0.1 * jax.random.normal(ks[ko + 2], (c,), jnp.float32)
        var = 1.0 + 0.05 * jnp.abs(jax.random.normal(ks[ko + 3], (c,), jnp.float32))
        p[f"s{i}"], p[f"b{i}"] = fold_bn(gamma, beta, mean, var)
    return p


def inverted_residual(x_nchw, params, *, inp, oup, stride, expand_ratio):
    assert stride in (1, 2)
    use_res = (stride == 1) and (inp == oup)
    hid = inp * expand_ratio

    B, C, H, W = x_nchw.shape
    assert C == inp
    Ho = (H + 2 - 3) // stride + 1
    Wo = (W + 2 - 3) // stride + 1

    cin_p = _round_up(inp, LANE)
    hid_p = _round_up(hid, LANE)
    oup_p = _round_up(oup, LANE)
    if use_res:
        assert cin_p == oup_p

    # NCHW -> NHWC + lane-dense channel zero-padding (sliced off at the end).
    # TODO(synk): fold the NCHW<->NHWC transposes into neighbouring ops once the
    # block is embedded in a full NHWC network.
    x = jnp.transpose(x_nchw, (0, 2, 3, 1))
    x = jnp.pad(x, ((0, 0), (0, 0), (0, 0), (0, cin_p - inp)))

    # Zero-padded weights and folded-BN scale/bias (zeros keep padded lanes 0).
    w1 = jnp.pad(params["w1"], ((0, cin_p - inp), (0, hid_p - hid))).astype(jnp.bfloat16)
    wd = jnp.pad(params["wd"], ((0, 0), (0, 0), (0, hid_p - hid)))
    w3 = jnp.pad(params["w3"], ((0, hid_p - hid), (0, oup_p - oup))).astype(jnp.bfloat16)
    s1 = jnp.pad(params["s1"], (0, hid_p - hid)).reshape(1, hid_p)
    b1 = jnp.pad(params["b1"], (0, hid_p - hid)).reshape(1, hid_p)
    s2 = jnp.pad(params["s2"], (0, hid_p - hid)).reshape(1, hid_p)
    b2 = jnp.pad(params["b2"], (0, hid_p - hid)).reshape(1, hid_p)
    s3 = jnp.pad(params["s3"], (0, oup_p - oup)).reshape(1, oup_p)
    b3 = jnp.pad(params["b3"], (0, oup_p - oup)).reshape(1, oup_p)

    kernel = functools.partial(_fused_block_kernel, stride=stride,
                               use_res=use_res, H=H, W=W, Ho=Ho, Wo=Wo)

    out = pl.pallas_call(
        kernel,
        out_shape=jax.ShapeDtypeStruct((B, Ho, Wo, oup_p), jnp.float32),
        grid=(B,),
        in_specs=[
            pl.BlockSpec((1, H, W, cin_p), lambda b: (b, 0, 0, 0)),   # x
            pl.BlockSpec((cin_p, hid_p), lambda b: (0, 0)),           # w1
            pl.BlockSpec((1, hid_p), lambda b: (0, 0)),               # s1
            pl.BlockSpec((1, hid_p), lambda b: (0, 0)),               # b1
            pl.BlockSpec((3, 3, hid_p), lambda b: (0, 0, 0)),         # wd
            pl.BlockSpec((1, hid_p), lambda b: (0, 0)),               # s2
            pl.BlockSpec((1, hid_p), lambda b: (0, 0)),               # b2
            pl.BlockSpec((hid_p, oup_p), lambda b: (0, 0)),           # w3
            pl.BlockSpec((1, oup_p), lambda b: (0, 0)),               # s3
            pl.BlockSpec((1, oup_p), lambda b: (0, 0)),               # b3
        ],
        out_specs=pl.BlockSpec((1, Ho, Wo, oup_p), lambda b: (b, 0, 0, 0)),
        scratch_shapes=[pltpu.VMEM((H + 2, W + 2, hid_p), jnp.float32)],
        compiler_params=pltpu.CompilerParams(
            dimension_semantics=("parallel",),
            vmem_limit_bytes=32 * 1024 * 1024,
        ),
    )(x, w1, s1, b1, wd, s2, b2, w3, s3, b3)

    y = out[..., :oup]                       # drop lane padding
    return jnp.transpose(y, (0, 3, 1, 2))    # back to NCHW


# ----------------------------------------------------------------------------
# pure-JAX reference (mirrors the kernel's bf16 matmul inputs, f32 accumulate)
# ----------------------------------------------------------------------------
def ref_forward(x_nchw, p, *, inp, oup, stride, expand_ratio):
    use_res = (stride == 1) and (inp == oup)
    hid = inp * expand_ratio
    x = jnp.transpose(x_nchw, (0, 2, 3, 1))
    B, H, W, _ = x.shape
    h = jnp.dot(x.reshape(-1, inp).astype(jnp.bfloat16),
                p["w1"].astype(jnp.bfloat16),
                preferred_element_type=jnp.float32).reshape(B, H, W, hid)
    h = jnp.clip(h * p["s1"] + p["b1"], 0.0, 6.0)
    Ho = (H + 2 - 3) // stride + 1
    Wo = (W + 2 - 3) // stride + 1
    hp = jnp.pad(h, ((0, 0), (1, 1), (1, 1), (0, 0)))
    acc = jnp.zeros((B, Ho, Wo, hid), jnp.float32)
    for ky in range(3):
        for kx in range(3):
            win = hp[:, ky:ky + stride * (Ho - 1) + 1:stride,
                        kx:kx + stride * (Wo - 1) + 1:stride, :]
            acc = acc + win * p["wd"][ky, kx]
    h2 = jnp.clip(acc * p["s2"] + p["b2"], 0.0, 6.0)
    y = jnp.dot(h2.reshape(-1, hid).astype(jnp.bfloat16),
                p["w3"].astype(jnp.bfloat16),
                preferred_element_type=jnp.float32).reshape(B, Ho, Wo, oup)
    y = y * p["s3"] + p["b3"]
    if use_res:
        y = y + x
    return jnp.transpose(y, (0, 3, 1, 2))


# ----------------------------------------------------------------------------
if __name__ == "__main__":
    # stride=1, inp==oup exercises the residual connection.
    inp, oup, stride, expand_ratio = 4, 4, 1, 6
    B, H, W = 2, 16, 16

    key = jax.random.PRNGKey(0)
    kx_, kp = jax.random.split(key)
    x = jax.random.normal(kx_, (B, inp, H, W), jnp.float32)
    params = make_params(kp, inp, oup, expand_ratio)

    out = inverted_residual(x, params, inp=inp, oup=oup,
                            stride=stride, expand_ratio=expand_ratio)
    out = jax.block_until_ready(out)

    ref = jax.block_until_ready(
        ref_forward(x, params, inp=inp, oup=oup,
                    stride=stride, expand_ratio=expand_ratio))
    np.testing.assert_allclose(np.asarray(out), np.asarray(ref),
                               rtol=1e-2, atol=1e-2)
    assert out.shape == (B, oup, H, W)
    print("KERNEL_OK")
</pallas_src>

<mosaic_0001>
module attributes {stable_mosaic.version = 11 : i64} {
  func.func @_fused_block_kernel(%arg0: i32, %arg1: memref<1x16x16x128xf32, #tpu.memory_space<vmem>>, %arg2: memref<128x128xbf16, #tpu.memory_space<vmem>>, %arg3: memref<1x128xf32, #tpu.memory_space<vmem>>, %arg4: memref<1x128xf32, #tpu.memory_space<vmem>>, %arg5: memref<3x3x128xf32, #tpu.memory_space<vmem>>, %arg6: memref<1x128xf32, #tpu.memory_space<vmem>>, %arg7: memref<1x128xf32, #tpu.memory_space<vmem>>, %arg8: memref<128x128xbf16, #tpu.memory_space<vmem>>, %arg9: memref<1x128xf32, #tpu.memory_space<vmem>>, %arg10: memref<1x128xf32, #tpu.memory_space<vmem>>, %arg11: memref<1x16x16x128xf32, #tpu.memory_space<vmem>>, %arg12: memref<18x18x128xf32, #tpu.memory_space<vmem>>) attributes {dimension_semantics = [#tpu.dimension_semantics<parallel>], iteration_bounds = array<i64: 2>, scalar_prefetch = 0 : i64, scratch_operands = 1 : i64, tpu.core_type = #tpu.core_type<tc>, window_params = [{transform_indices = @transform_0, window_bounds = array<i64: 1, 16, 16, 128>}, {pipeline_mode = #tpu.pipeline_mode<synchronous>, transform_indices = @transform_1, window_bounds = array<i64: 128, 128>}, {pipeline_mode = #tpu.pipeline_mode<synchronous>, transform_indices = @transform_2, window_bounds = array<i64: 1, 128>}, {pipeline_mode = #tpu.pipeline_mode<synchronous>, transform_indices = @transform_3, window_bounds = array<i64: 1, 128>}, {pipeline_mode = #tpu.pipeline_mode<synchronous>, transform_indices = @transform_4, window_bounds = array<i64: 3, 3, 128>}, {pipeline_mode = #tpu.pipeline_mode<synchronous>, transform_indices = @transform_5, window_bounds = array<i64: 1, 128>}, {pipeline_mode = #tpu.pipeline_mode<synchronous>, transform_indices = @transform_6, window_bounds = array<i64: 1, 128>}, {pipeline_mode = #tpu.pipeline_mode<synchronous>, transform_indices = @transform_7, window_bounds = array<i64: 128, 128>}, {pipeline_mode = #tpu.pipeline_mode<synchronous>, transform_indices = @transform_8, window_bounds = array<i64: 1, 128>}, {pipeline_mode = #tpu.pipeline_mode<synchronous>, transform_indices = @transform_9, window_bounds = array<i64: 1, 128>}, {transform_indices = @transform_10, window_bounds = array<i64: 1, 16, 16, 128>}]} {
    %cst = arith.constant 0.000000e+00 : f32
    %0 = vector.broadcast %cst : f32 to vector<18x18x128xf32>
    %c0 = arith.constant 0 : index
    %c0_0 = arith.constant 0 : index
    %c0_1 = arith.constant 0 : index
    %1 = vector.load %arg12[%c0, %c0_0, %c0_1] : memref<18x18x128xf32, #tpu.memory_space<vmem>>, vector<18x18x128xf32>
    tpu.vector_store %arg12[%c0, %c0_0, %c0_1], %0 {strides = array<i32>} : memref<18x18x128xf32, #tpu.memory_space<vmem>>, vector<18x18x128xf32>,
    %c0_2 = arith.constant 0 : index
    %c0_3 = arith.constant 0 : index
    %c0_4 = arith.constant 0 : index
    %c0_5 = arith.constant 0 : index
    %2 = vector.load %arg1[%c0_2, %c0_3, %c0_4, %c0_5] : memref<1x16x16x128xf32, #tpu.memory_space<vmem>>, vector<1x16x16x128xf32>
    %3 = vector.shape_cast %2 : vector<1x16x16x128xf32> to vector<16x16x128xf32>
    %4 = vector.shape_cast %3 : vector<16x16x128xf32> to vector<256x128xf32>
    %5 = arith.truncf %4 : vector<256x128xf32> to vector<256x128xbf16>
    %c0_6 = arith.constant 0 : index
    %c0_7 = arith.constant 0 : index
    %6 = vector.load %arg2[%c0_6, %c0_7] : memref<128x128xbf16, #tpu.memory_space<vmem>>, vector<128x128xbf16>
    %cst_8 = arith.constant dense<0.000000e+00> : vector<256x128xf32>
    %7 = tpu.matmul %5, %6, %cst_8 {dimension_numbers = #tpu.dot_dimension_numbers<[1], [0], [0], [1], [0, 0, 1, 1], [], []>} : vector<256x128xbf16>, vector<128x128xbf16>, vector<256x128xf32> -> vector<256x128xf32>
    %c0_9 = arith.constant 0 : index
    %c0_10 = arith.constant 0 : index
    %8 = vector.load %arg3[%c0_9, %c0_10] : memref<1x128xf32, #tpu.memory_space<vmem>>, vector<1x128xf32>
    %9 = vector.broadcast %8 : vector<1x128xf32> to vector<256x128xf32>
    %10 = arith.mulf %7, %9 : vector<256x128xf32>
    %c0_11 = arith.constant 0 : index
    %c0_12 = arith.constant 0 : index
    %11 = vector.load %arg4[%c0_11, %c0_12] : memref<1x128xf32, #tpu.memory_space<vmem>>, vector<1x128xf32>
    %12 = vector.broadcast %11 : vector<1x128xf32> to vector<256x128xf32>
    %13 = arith.addf %10, %12 : vector<256x128xf32>
    %cst_13 = arith.constant 0.000000e+00 : f32
    %cst_14 = arith.constant 6.000000e+00 : f32
    %14 = vector.broadcast %cst_13 : f32 to vector<256x128xf32>
    %15 = arith.maximumf %14, %13 : vector<256x128xf32>
    %16 = vector.broadcast %cst_14 : f32 to vector<256x128xf32>
    %17 = arith.minimumf %16, %15 : vector<256x128xf32>
    %18 = vector.shape_cast %17 : vector<256x128xf32> to vector<16x16x128xf32>
    %c1 = arith.constant 1 : index
    %c1_15 = arith.constant 1 : index
    %c0_16 = arith.constant 0 : index
    %19 = vector.load %arg12[%c1, %c1_15, %c0_16] : memref<18x18x128xf32, #tpu.memory_space<vmem>>, vector<16x16x128xf32>
    tpu.vector_store %arg12[%c1, %c1_15, %c0_16], %18 {strides = array<i32>} : memref<18x18x128xf32, #tpu.memory_space<vmem>>, vector<16x16x128xf32>,
    %c0_17 = arith.constant 0 : index
    %c0_18 = arith.constant 0 : index
    %c0_19 = arith.constant 0 : index
    %20 = vector.load %arg5[%c0_17, %c0_18, %c0_19] : memref<3x3x128xf32, #tpu.memory_space<vmem>>, vector<3x3x128xf32>
    %cst_20 = arith.constant 0.000000e+00 : f32
    %21 = vector.broadcast %cst_20 : f32 to vector<16x16x128xf32>
    %c0_21 = arith.constant 0 : index
    %c0_22 = arith.constant 0 : index
    %c0_23 = arith.constant 0 : index
    %22 = vector.load %arg12[%c0_21, %c0_22, %c0_23] : memref<18x18x128xf32, #tpu.memory_space<vmem>>, vector<16x16x128xf32>
    %23 = vector.extract_strided_slice %20 {offsets = [0, 0, 0], sizes = [1, 1, 128], strides = [1, 1, 1]} : vector<3x3x128xf32> to vector<1x1x128xf32>
    %24 = vector.shape_cast %23 : vector<1x1x128xf32> to vector<128xf32>
    %25 = vector.shape_cast %24 : vector<128xf32> to vector<1x1x128xf32>
    %26 = vector.broadcast %25 : vector<1x1x128xf32> to vector<16x16x128xf32>
    %27 = arith.mulf %22, %26 : vector<16x16x128xf32>
    %28 = arith.addf %21, %27 : vector<16x16x128xf32>
    %c0_24 = arith.constant 0 : index
    %c1_25 = arith.constant 1 : index
    %c0_26 = arith.constant 0 : index
    %29 = vector.load %arg12[%c0_24, %c1_25, %c0_26] : memref<18x18x128xf32, #tpu.memory_space<vmem>>, vector<16x16x128xf32>
    %30 = vector.extract_strided_slice %20 {offsets = [0, 1, 0], sizes = [1, 1, 128], strides = [1, 1, 1]} : vector<3x3x128xf32> to vector<1x1x128xf32>
    %31 = vector.shape_cast %30 : vector<1x1x128xf32> to vector<128xf32>
    %32 = vector.shape_cast %31 : vector<128xf32> to vector<1x1x128xf32>
    %33 = vector.broadcast %32 : vector<1x1x128xf32> to vector<16x16x128xf32>
    %34 = arith.mulf %29, %33 : vector<16x16x128xf32>
    %35 = arith.addf %28, %34 : vector<16x16x128xf32>
    %c0_27 = arith.constant 0 : index
    %c2 = arith.constant 2 : index
    %c0_28 = arith.constant 0 : index
    %36 = vector.load %arg12[%c0_27, %c2, %c0_28] : memref<18x18x128xf32, #tpu.memory_space<vmem>>, vector<16x16x128xf32>
    %37 = vector.extract_strided_slice %20 {offsets = [0, 2, 0], sizes = [1, 1, 128], strides = [1, 1, 1]} : vector<3x3x128xf32> to vector<1x1x128xf32>
    %38 = vector.shape_cast %37 : vector<1x1x128xf32> to vector<128xf32>
    %39 = vector.shape_cast %38 : vector<128xf32> to vector<1x1x128xf32>
    %40 = vector.broadcast %39 : vector<1x1x128xf32> to vector<16x16x128xf32>
    %41 = arith.mulf %36, %40 : vector<16x16x128xf32>
    %42 = arith.addf %35, %41 : vector<16x16x128xf32>
    %c1_29 = arith.constant 1 : index
    %c0_30 = arith.constant 0 : index
    %c0_31 = arith.constant 0 : index
    %43 = vector.load %arg12[%c1_29, %c0_30, %c0_31] : memref<18x18x128xf32, #tpu.memory_space<vmem>>, vector<16x16x128xf32>
    %44 = vector.extract_strided_slice %20 {offsets = [1, 0, 0], sizes = [1, 1, 128], strides = [1, 1, 1]} : vector<3x3x128xf32> to vector<1x1x128xf32>
    %45 = vector.shape_cast %44 : vector<1x1x128xf32> to vector<128xf32>
    %46 = vector.shape_cast %45 : vector<128xf32> to vector<1x1x128xf32>
    %47 = vector.broadcast %46 : vector<1x1x128xf32> to vector<16x16x128xf32>
    %48 = arith.mulf %43, %47 : vector<16x16x128xf32>
    %49 = arith.addf %42, %48 : vector<16x16x128xf32>
    %c1_32 = arith.constant 1 : index
    %c1_33 = arith.constant 1 : index
    %c0_34 = arith.constant 0 : index
    %50 = vector.load %arg12[%c1_32, %c1_33, %c0_34] : memref<18x18x128xf32, #tpu.memory_space<vmem>>, vector<16x16x128xf32>
    %51 = vector.extract_strided_slice %20 {offsets = [1, 1, 0], sizes = [1, 1, 128], strides = [1, 1, 1]} : vector<3x3x128xf32> to vector<1x1x128xf32>
    %52 = vector.shape_cast %51 : vector<1x1x128xf32> to vector<128xf32>
    %53 = vector.shape_cast %52 : vector<128xf32> to vector<1x1x128xf32>
    %54 = vector.broadcast %53 : vector<1x1x128xf32> to vector<16x16x128xf32>
    %55 = arith.mulf %50, %54 : vector<16x16x128xf32>
    %56 = arith.addf %49, %55 : vector<16x16x128xf32>
    %c1_35 = arith.constant 1 : index
    %c2_36 = arith.constant 2 : index
    %c0_37 = arith.constant 0 : index
    %57 = vector.load %arg12[%c1_35, %c2_36, %c0_37] : memref<18x18x128xf32, #tpu.memory_space<vmem>>, vector<16x16x128xf32>
    %58 = vector.extract_strided_slice %20 {offsets = [1, 2, 0], sizes = [1, 1, 128], strides = [1, 1, 1]} : vector<3x3x128xf32> to vector<1x1x128xf32>
    %59 = vector.shape_cast %58 : vector<1x1x128xf32> to vector<128xf32>
    %60 = vector.shape_cast %59 : vector<128xf32> to vector<1x1x128xf32>
    %61 = vector.broadcast %60 : vector<1x1x128xf32> to vector<16x16x128xf32>
    %62 = arith.mulf %57, %61 : vector<16x16x128xf32>
    %63 = arith.addf %56, %62 : vector<16x16x128xf32>
    %c2_38 = arith.constant 2 : index
    %c0_39 = arith.constant 0 : index
    %c0_40 = arith.constant 0 : index
    %64 = vector.load %arg12[%c2_38, %c0_39, %c0_40] : memref<18x18x128xf32, #tpu.memory_space<vmem>>, vector<16x16x128xf32>
    %65 = vector.extract_strided_slice %20 {offsets = [2, 0, 0], sizes = [1, 1, 128], strides = [1, 1, 1]} : vector<3x3x128xf32> to vector<1x1x128xf32>
    %66 = vector.shape_cast %65 : vector<1x1x128xf32> to vector<128xf32>
    %67 = vector.shape_cast %66 : vector<128xf32> to vector<1x1x128xf32>
    %68 = vector.broadcast %67 : vector<1x1x128xf32> to vector<16x16x128xf32>
    %69 = arith.mulf %64, %68 : vector<16x16x128xf32>
    %70 = arith.addf %63, %69 : vector<16x16x128xf32>
    %c2_41 = arith.constant 2 : index
    %c1_42 = arith.constant 1 : index
    %c0_43 = arith.constant 0 : index
    %71 = vector.load %arg12[%c2_41, %c1_42, %c0_43] : memref<18x18x128xf32, #tpu.memory_space<vmem>>, vector<16x16x128xf32>
    %72 = vector.extract_strided_slice %20 {offsets = [2, 1, 0], sizes = [1, 1, 128], strides = [1, 1, 1]} : vector<3x3x128xf32> to vector<1x1x128xf32>
    %73 = vector.shape_cast %72 : vector<1x1x128xf32> to vector<128xf32>
    %74 = vector.shape_cast %73 : vector<128xf32> to vector<1x1x128xf32>
    %75 = vector.broadcast %74 : vector<1x1x128xf32> to vector<16x16x128xf32>
    %76 = arith.mulf %71, %75 : vector<16x16x128xf32>
    %77 = arith.addf %70, %76 : vector<16x16x128xf32>
    %c2_44 = arith.constant 2 : index
    %c2_45 = arith.constant 2 : index
    %c0_46 = arith.constant 0 : index
    %78 = vector.load %arg12[%c2_44, %c2_45, %c0_46] : memref<18x18x128xf32, #tpu.memory_space<vmem>>, vector<16x16x128xf32>
    %79 = vector.extract_strided_slice %20 {offsets = [2, 2, 0], sizes = [1, 1, 128], strides = [1, 1, 1]} : vector<3x3x128xf32> to vector<1x1x128xf32>
    %80 = vector.shape_cast %79 : vector<1x1x128xf32> to vector<128xf32>
    %81 = vector.shape_cast %80 : vector<128xf32> to vector<1x1x128xf32>
    %82 = vector.broadcast %81 : vector<1x1x128xf32> to vector<16x16x128xf32>
    %83 = arith.mulf %78, %82 : vector<16x16x128xf32>
    %84 = arith.addf %77, %83 : vector<16x16x128xf32>
    %c0_47 = arith.constant 0 : index
    %c0_48 = arith.constant 0 : index
    %85 = vector.load %arg6[%c0_47, %c0_48] : memref<1x128xf32, #tpu.memory_space<vmem>>, vector<1x128xf32>
    %86 = vector.shape_cast %85 : vector<1x128xf32> to vector<128xf32>
    %87 = vector.shape_cast %86 : vector<128xf32> to vector<1x1x128xf32>
    %88 = vector.broadcast %87 : vector<1x1x128xf32> to vector<16x16x128xf32>
    %89 = arith.mulf %84, %88 : vector<16x16x128xf32>
    %c0_49 = arith.constant 0 : index
    %c0_50 = arith.constant 0 : index
    %90 = vector.load %arg7[%c0_49, %c0_50] : memref<1x128xf32, #tpu.memory_space<vmem>>, vector<1x128xf32>
    %91 = vector.shape_cast %90 : vector<1x128xf32> to vector<128xf32>
    %92 = vector.shape_cast %91 : vector<128xf32> to vector<1x1x128xf32>
    %93 = vector.broadcast %92 : vector<1x1x128xf32> to vector<16x16x128xf32>
    %94 = arith.addf %89, %93 : vector<16x16x128xf32>
    %cst_51 = arith.constant 0.000000e+00 : f32
    %cst_52 = arith.constant 6.000000e+00 : f32
    %95 = vector.broadcast %cst_51 : f32 to vector<16x16x128xf32>
    %96 = arith.maximumf %95, %94 : vector<16x16x128xf32>
    %97 = vector.broadcast %cst_52 : f32 to vector<16x16x128xf32>
    %98 = arith.minimumf %97, %96 : vector<16x16x128xf32>
    %99 = vector.shape_cast %98 : vector<16x16x128xf32> to vector<256x128xf32>
    %100 = arith.truncf %99 : vector<256x128xf32> to vector<256x128xbf16>
    %c0_53 = arith.constant 0 : index
    %c0_54 = arith.constant 0 : index
    %101 = vector.load %arg8[%c0_53, %c0_54] : memref<128x128xbf16, #tpu.memory_space<vmem>>, vector<128x128xbf16>
    %cst_55 = arith.constant dense<0.000000e+00> : vector<256x128xf32>
    %102 = tpu.matmul %100, %101, %cst_55 {dimension_numbers = #tpu.dot_dimension_numbers<[1], [0], [0], [1], [0, 0, 1, 1], [], []>} : vector<256x128xbf16>, vector<128x128xbf16>, vector<256x128xf32> -> vector<256x128xf32>
    %c0_56 = arith.constant 0 : index
    %c0_57 = arith.constant 0 : index
    %103 = vector.load %arg9[%c0_56, %c0_57] : memref<1x128xf32, #tpu.memory_space<vmem>>, vector<1x128xf32>
    %104 = vector.broadcast %103 : vector<1x128xf32> to vector<256x128xf32>
    %105 = arith.mulf %102, %104 : vector<256x128xf32>
    %c0_58 = arith.constant 0 : index
    %c0_59 = arith.constant 0 : index
    %106 = vector.load %arg10[%c0_58, %c0_59] : memref<1x128xf32, #tpu.memory_space<vmem>>, vector<1x128xf32>
    %107 = vector.broadcast %106 : vector<1x128xf32> to vector<256x128xf32>
    %108 = arith.addf %105, %107 : vector<256x128xf32>
    %109 = vector.shape_cast %3 : vector<16x16x128xf32> to vector<256x128xf32>
    %110 = arith.addf %108, %109 : vector<256x128xf32>
    %111 = vector.shape_cast %110 : vector<256x128xf32> to vector<16x16x128xf32>
    %c0_60 = arith.constant 0 : index
    %c0_61 = arith.constant 0 : index
    %c0_62 = arith.constant 0 : index
    %c0_63 = arith.constant 0 : index
    %112 = vector.load %arg11[%c0_60, %c0_61, %c0_62, %c0_63] : memref<1x16x16x128xf32, #tpu.memory_space<vmem>>, vector<1x16x16x128xf32>
    %113 = vector.shape_cast %112 : vector<1x16x16x128xf32> to vector<16x16x128xf32>
    %114 = vector.shape_cast %111 : vector<16x16x128xf32> to vector<1x16x16x128xf32>
    tpu.vector_store %arg11[%c0_60, %c0_61, %c0_62, %c0_63], %114 {strides = array<i32>} : memref<1x16x16x128xf32, #tpu.memory_space<vmem>>, vector<1x16x16x128xf32>,
    return
  }
  func.func @transform_0(%arg0: i32) -> (i32, i32, i32, i32) {
    %c0_i32 = arith.constant 0 : i32
    %c0_i32_0 = arith.constant 0 : i32
    %c0_i32_1 = arith.constant 0 : i32
    %c0_i32_2 = arith.constant 0 : i32
    return %arg0, %c0_i32, %c0_i32_0, %c0_i32_1 : i32, i32, i32, i32
  }
  func.func @transform_1(%arg0: i32) -> (i32, i32) {
    %c0_i32 = arith.constant 0 : i32
    %c0_i32_0 = arith.constant 0 : i32
    %c0_i32_1 = arith.constant 0 : i32
    return %c0_i32, %c0_i32_0 : i32, i32
  }
  func.func @transform_2(%arg0: i32) -> (i32, i32) {
    %c0_i32 = arith.constant 0 : i32
    %c0_i32_0 = arith.constant 0 : i32
    %c0_i32_1 = arith.constant 0 : i32
    return %c0_i32, %c0_i32_0 : i32, i32
  }
  func.func @transform_3(%arg0: i32) -> (i32, i32) {
    %c0_i32 = arith.constant 0 : i32
    %c0_i32_0 = arith.constant 0 : i32
    %c0_i32_1 = arith.constant 0 : i32
    return %c0_i32, %c0_i32_0 : i32, i32
  }
  func.func @transform_4(%arg0: i32) -> (i32, i32, i32) {
    %c0_i32 = arith.constant 0 : i32
    %c0_i32_0 = arith.constant 0 : i32
    %c0_i32_1 = arith.constant 0 : i32
    %c0_i32_2 = arith.constant 0 : i32
    return %c0_i32, %c0_i32_0, %c0_i32_1 : i32, i32, i32
  }
  func.func @transform_5(%arg0: i32) -> (i32, i32) {
    %c0_i32 = arith.constant 0 : i32
    %c0_i32_0 = arith.constant 0 : i32
    %c0_i32_1 = arith.constant 0 : i32
    return %c0_i32, %c0_i32_0 : i32, i32
  }
  func.func @transform_6(%arg0: i32) -> (i32, i32) {
    %c0_i32 = arith.constant 0 : i32
    %c0_i32_0 = arith.constant 0 : i32
    %c0_i32_1 = arith.constant 0 : i32
    return %c0_i32, %c0_i32_0 : i32, i32
  }
  func.func @transform_7(%arg0: i32) -> (i32, i32) {
    %c0_i32 = arith.constant 0 : i32
    %c0_i32_0 = arith.constant 0 : i32
    %c0_i32_1 = arith.constant 0 : i32
    return %c0_i32, %c0_i32_0 : i32, i32
  }
  func.func @transform_8(%arg0: i32) -> (i32, i32) {
    %c0_i32 = arith.constant 0 : i32
    %c0_i32_0 = arith.constant 0 : i32
    %c0_i32_1 = arith.constant 0 : i32
    return %c0_i32, %c0_i32_0 : i32, i32
  }
  func.func @transform_9(%arg0: i32) -> (i32, i32) {
    %c0_i32 = arith.constant 0 : i32
    %c0_i32_0 = arith.constant 0 : i32
    %c0_i32_1 = arith.constant 0 : i32
    return %c0_i32, %c0_i32_0 : i32, i32
  }
  func.func @transform_10(%arg0: i32) -> (i32, i32, i32, i32) {
    %c0_i32 = arith.constant 0 : i32
    %c0_i32_0 = arith.constant 0 : i32
    %c0_i32_1 = arith.constant 0 : i32
    %c0_i32_2 = arith.constant 0 : i32
    return %arg0, %c0_i32, %c0_i32_0, %c0_i32_1 : i32, i32, i32, i32
  }
}

</mosaic_0001>

<bundles_post_ra>
// kernel: tpu_custom_call.1
= control target key start
LH: loop header
LB: loop body
LE: loop exit
PB: predicated region body
PF: predicated region fallthrough
CT: control target
= control target key end

     0   :  { %s4333_s0 = inlined_call_operand.hbm [shape: f32[2,16,16,128], index: 0, kind: input, shape index: {}]   ;;  %s4334_s1 = inlined_call_operand.hbm [shape: bf16[128,128], index: 1, kind: input, shape index: {}]   ;;  %s4335_s2 = inlined_call_operand.vmem [shape: f32[1,128], index: 2, kind: input, shape index: {}]   ;;  %s4336_s3 = inlined_call_operand.vmem [shape: f32[1,128], index: 3, kind: input, shape index: {}]   ;;  %s4337_s4 = inlined_call_operand.hbm [shape: f32[3,3,128], index: 4, kind: input, shape index: {}]   ;;  %s4338_s5 = inlined_call_operand.vmem [shape: f32[1,128], index: 5, kind: input, shape index: {}]   ;;  %s4339_s6 = inlined_call_operand.vmem [shape: f32[1,128], index: 6, kind: input, shape index: {}]   ;;  %s4340_s7 = inlined_call_operand.hbm [shape: bf16[128,128], index: 7, kind: input, shape index: {}]   ;;  %s4341_s8 = inlined_call_operand.vmem [shape: f32[1,128], index: 8, kind: input, shape index: {}]   ;;  %s4342_s9 = inlined_call_operand.vmem [shape: f32[1,128], index: 9, kind: input, shape index: {}]   ;;  %s4343_s10 = inlined_call_operand.hbm [shape: f32[2,16,16,128], index: 10, kind: output, shape index: {}]  }
   0x1   :  { %4348 = sst [smem:[#allocation17_spill]] %s4334_s1 }
   0x2   :  { %4349 = sst [smem:[#allocation18_spill]] %s4337_s4 }
   0x3   :  { %4350 = sst [smem:[#allocation19_spill]] %s4340_s7 }
   0x4   :  { %15 = vsyncpa [#allocation4], 0 }
   0x5   :  { %17 = vsyncpa [#allocation4 + $0x1], 0 }
   0x6   :  { %18 = vsyncpa [#allocation7], 0 }
   0x7   :  { %19 = vsyncpa [#allocation10], 0 }
   0x8   :  { %20 = vsyncpa [#allocation5], 0 }
   0x9   :  { %22 = vsyncpa [#allocation5 + $0x1], 0  ;;  %s3040_s13 = smov 0   ;;  %s3042_s14 = smov 0  }
   0xa   :  { %s3044_s15 = smov 0   ;;  %s3046_s16 = smov 0  }
   0xb LB: > { %s3061_s17 = sadd.s32 4294967295, %s2971_s16   ;;  %s2470_s18 = sadd.s32 4294967294, %s2971_s16   ;;  %s2971_s16 = sphi %s3046_s16, %s4375_s16   ;;  %s2967_s15 = sphi %s3044_s15, %s4374_s15   ;;  %s2963_s14 = sphi %s3042_s14, %s4373_s14   ;;  %s2959_s13 = sphi %s3040_s13, %s4372_s13  }
   0xc   : > { %p48_p0 = scmp.ne.s32.totalorder %s2963_s14, %s2959_s13  ;;  %p4344_p1 = scmp.eq.s32.totalorder %s3061_s17, 0 }
   0xd   : > { %p267_p3 = scmp.eq.s32.totalorder %s2470_s18, 1  ;;  %p2471_p5 = scmp.ge.s32.totalorder %s2971_s16, 1 }
   0xe   : > { %p3070_p4 = por %p4344_p1, %p48_p0  ;;  %p274_p7 = scmp.lt.s32.totalorder %s2971_s16, 3 }
   0xf   : > { %p3075_p6 = por %p267_p3, %p48_p0  ;;  %s2973_s22 = smov [#allocation6]  }
  0x10   : > { %s4351_s19 = scalar_select %p3070_p4, 1, 0 }
  0x11   : > { %s4352_s20 = scalar_select %p3075_p6, 1, 0 }
  0x12   : > { %p3080_p8 = pnand %p2471_p5, %p274_p7  ;;  %s286_s23 = sshll.u32 %s2973_s22, 4  ;;  %s287_s23 = int_to_ptr.vmem [resolvable:$true] %s286_s23 }
  0x13   : > { %s2974_s25 = smov [#allocation8]   ;;  %s2975_s27 = smov [#allocation9]  }
  0x14   : > { %s4353_s21 = scalar_select %p3080_p8, 1, 0 }
  0x15   : > { %p2674_p9 = pneg %p3080_p8  ;;  %s305_s26 = sshll.u32 %s2974_s25, 4  ;;  %s306_s26 = int_to_ptr.vmem [resolvable:$true] %s305_s26 }
  0x16   : > { %s324_s28 = sshll.u32 %s2975_s27, 4  ;;  %s2804_s29 = scalar_lea.vmem %s287_s23, 1024  ;;  %s325_s28 = int_to_ptr.vmem [resolvable:$true] %s324_s28 }
  0x17   : > { %p3089_p11 = pnand %p2674_p9, %p4344_p1  ;;  %p2805_p13 = scmp.ne.s32.totalorder %s287_s23, %s2804_s29 }
  0x18   : > { %p2812_p5 = scmp.lt.s32.totalorder %s287_s23, %s287_s23  ;;  %p2813_p7 = scmp.lt.s32.totalorder %s2804_s29, %s2804_s29 }
  0x19   : > { %p2795_p12 = pneg %p3089_p11 }
  0x1a   : > { %p2814_p9 = por %p2813_p7, %p2812_p5 }
  0x1b   : > { %p2807_p0 = pnand %p2805_p13, %p2795_p12 }
  0x1d   : > { %p2808_p3 = pneg %p2807_p0 }
  0x1f   : > { %p2815_p10 = pnand %p2814_p9, %p2808_p3 }
  0x21   : > { %2818 = shalt.err (!%p2815_p10)
}
  0x22   : > { %s2976_s30 = smov 64   ;;  %s2977_s11 = smov 4  }
  0x23   : > { %s4355_s1 = sld [smem:[#allocation17_spill]]  ;;  %s2830_s22 = scalar_lea.vmem %s306_s26, 192 }
  0x24   : > { %p2831_p1 = scmp.ne.s32.totalorder %s306_s26, %s2830_s22  ;;  %p2838_p2 = scmp.lt.s32.totalorder %s306_s26, %s306_s26 }
  0x25   : > { %p2839_p6 = scmp.lt.s32.totalorder %s2830_s22, %s2830_s22 }
  0x26   : > { %p2833_p13 = pnand %p2831_p1, %p2795_p12 }
  0x27   : > { %p2840_p5 = por %p2839_p6, %p2838_p2 }
  0x28   : > { %p2834_p0 = pneg %p2833_p13 }
  0x29   : > { %2677 = dma.hbm_to_vmem [thread:$0]  (!%p3089_p11), %s4355_s1, 1024, %s287_s23, [#allocation7], %s2976_s30, %s2976_s30, %s2977_s11  }
  0x2a   : > { %p2841_p3 = pnand %p2840_p5, %p2834_p0 }
  0x2c   : > { %2844 = shalt.err (!%p2841_p3)
}
  0x2d   : > { %s4356_s4 = sld [smem:[#allocation18_spill]]  ;;  %s2856_s23 = scalar_lea.vmem %s325_s28, 1024 }
  0x2e   : > { %p2857_p10 = scmp.ne.s32.totalorder %s325_s28, %s2856_s23  ;;  %p2864_p9 = scmp.lt.s32.totalorder %s325_s28, %s325_s28 }
  0x2f   : > { %p2865_p13 = scmp.lt.s32.totalorder %s2856_s23, %s2856_s23 }
  0x30   : > { %p2859_p7 = pnand %p2857_p10, %p2795_p12 }
  0x31   : > { %p2866_p4 = por %p2865_p13, %p2864_p9 }
  0x32   : > { %p2860_p1 = pneg %p2859_p7 }
  0x33   : > { %2680 = dma.hbm_to_vmem [thread:$0]  (!%p3089_p11), %s4356_s4, 192, %s306_s26, [#allocation7], %s2976_s30, %s2976_s30, %s2977_s11  }
  0x34   : > { %p2867_p2 = pnand %p2866_p4, %p2860_p1 }
  0x36   : > { %2870 = shalt.err (!%p2867_p2)
}
  0x37   : > { %s4357_s7 = sld [smem:[#allocation19_spill]]  ;;  %s3120_s26 = sadd.s32 1, %s2971_s16  }
  0x38   : > { %s32_s18 = ssub.s32 %s2971_s16, %s3120_s26  ;;  %s35_s24 = sadd.s32 1, %s2967_s15 }
  0x39   : > { %p33_p4 = scmp.eq.s32.totalorder %s32_s18, 0  ;;  %p42_p6 = scmp.ne.s32.totalorder %s2967_s15, %s2963_s14 }
  0x3a   : > { %p43_p12 = scmp.eq.s32.totalorder %s2971_s16, 0  ;;  %p2695_p0 = scmp.lt.s32.totalorder %s2971_s16, 2 }
  0x3b   : > { %s3130_s22 = scalar_select %p33_p4, %s2967_s15, %s35_s24  }
  0x3c   : > { %p44_p5 = por %p43_p12, %p42_p6  ;;  %p4359_p3 = scmp.eq.s32.totalorder %s3061_s17, 1 }
  0x3d   : > { %2683 = dma.hbm_to_vmem [thread:$0]  (!%p3089_p11), %s4357_s7, 1024, %s325_s28, [#allocation10], %s2976_s30, %s2976_s30, %s2977_s11  }
  0x3e   : > { %4358 = sst [smem:[#allocation16_spill]] %s3130_s22  ;;  %p3134_p10 = por %p4359_p3, %p42_p6 }
  0x3f   : > { %s344_s27 = sand.u32 1, %s2967_s15   ;;  %s2512_s23 = sshll.u32 %s2971_s16, 12 }
  0x40   : > { %s4360_s25 = scalar_select %p3134_p10, 1, 0 }
  0x41   : > { %s2476_s28 = sshll.u32 %s344_s27, 8  ;;  %s3143_s29 = scalar_lea.hbm %s4333_s0, %s2512_s23 }
  0x42   : > { %s348_s12 = scalar_lea.vmem [#allocation3], %s2476_s28  ;;  %p3145_p11 = pnand %p2695_p0, %p44_p5 }
  0x43   : > { %s355_s18 = sshll.u32 %s348_s12, 4  ;;  %s3151_s1 = scalar_lea.sflag [#allocation4], %s344_s27  ;;  %s3149_s18 = int_to_ptr.vmem [resolvable:$true] %s355_s18 }
  0x44   : > { %s2871_s4 = scalar_lea.hbm %s3143_s29, 4096  ;;  %p2873_p1 = pneg %p3145_p11 }
  0x45   : > { %p2872_p7 = scmp.ne.s32.totalorder %s3143_s29, %s2871_s4  ;;  %s2876_s28 = scalar_lea.hbm %s4333_s0, 8192 }
  0x46   : > { %p2877_p2 = scmp.lt.s32.totalorder %s3143_s29, %s4333_s0  ;;  %p2878_p4 = scmp.lt.s32.totalorder %s2876_s28, %s2871_s4 }
  0x47   : > { %p2874_p9 = pnand %p2873_p1, %p2872_p7 }
  0x48   : > { %p2879_p6 = por %p2878_p4, %p2877_p2 }
  0x49   : > { %p2875_p13 = pneg %p2874_p9 }
  0x4b   : > { %p2880_p12 = pnand %p2879_p6, %p2875_p13 }
  0x4d   : > { %2883 = shalt.err (!%p2880_p12)
}
  0x4e   : > { %s2884_s27 = scalar_lea.vmem %s3149_s18, 4096  ;;  %s2978_s7 = smov [#allocation3]  }
  0x4f   : > { %p2885_p0 = scmp.ne.s32.totalorder %s3149_s18, %s2884_s27  ;;  %s2889_s22 = sshll.u32 %s2978_s7, 4  ;;  %s2890_s22 = int_to_ptr.vmem [resolvable:$false] %s2889_s22 }
  0x50   : > { %s2891_s23 = scalar_lea.vmem %s2890_s22, 8192  ;;  %p2892_p7 = scmp.lt.s32.totalorder %s3149_s18, %s2890_s22 }
  0x51   : > { %p2887_p5 = pnand %p2885_p0, %p2873_p1  ;;  %p2893_p9 = scmp.lt.s32.totalorder %s2891_s23, %s2884_s27 }
  0x53   : > { %p2888_p3 = pneg %p2887_p5  ;;  %p2894_p10 = por %p2893_p9, %p2892_p7 }
  0x55   : > { %p2895_p8 = pnand %p2894_p10, %p2888_p3 }
  0x57   : > { %2898 = shalt.err (!%p2895_p8)
}
  0x58   : > { %s2979_s4 = smov 128   ;;  %s2980_s30 = smov 8  }
  0x59   : > { %2687 = dma.hbm_to_vmem [thread:$0]  (!%p3145_p11), %s3143_s29, 4096, %s3149_s18, %s3151_s1, %s2979_s4, %s2979_s4, %s2980_s30  }
  0x5a   : > { %p4362_p1 = scmp.ne.s32.totalorder %s4353_s21, 0 }
  0x5b   : > { %s3175_s7 = sand.u32 (!%p4362_p1), 1, %s2963_s14   ;;  %p4363_p8 = scmp.ne.s32.totalorder (!%p4362_p1), %s4351_s19, 0 }
  0x5c   : > { %367 = sbr.rel (%p4362_p1) target bundleno = 770 (0x302), region = 60  ;;  %s2480_s22 = sshll.u32 (!%p4362_p1), %s3175_s7, 8 }
  0x5d   : > { %s370_s28 = scalar_lea.sflag (!%p4362_p1), [#allocation4], %s3175_s7  ;;  %s3181_s11 = scalar_lea.vmem (!%p4362_p1), [#allocation3], %s2480_s22 }
  0x61   : > { %2942 = dma.done.wait (%p4363_p8), %s370_s28, 4096  }
  0x62   : > { %2944 = vsyncadd (%p4363_p8), %s370_s28, 4294963200  ;;  %p4364_p10 = scmp.eq.s32.totalorder %s3061_s17, 0 }
  0x64   : > { %2946 = dma.done.wait (%p4364_p10), [#allocation7], 1216   ;;  %p4365_p11 = pmov %p4364_p10 }
  0x65   : > { %p4366_p13 = pmov %p4364_p10 }
  0x66   : > { %2948 = vsyncadd (%p4365_p11), [#allocation7], 4294966080 }
  0x67   : > { %2950 = dma.done.wait (%p4366_p13), [#allocation10], 1024   ;;  %p4367_p2 = pmov %p4364_p10 }
  0x68   : > { %v2981_v0 = vmov 0.0   ;;  %v2742_v1 = vld [vmem:[#allocation6 + $0x38] sm:$0xff]   ;;  %v2743_v2 = vld [vmem:[#allocation6 + $0x30] sm:$0xff]   ;;  %v2744_v3 = vld [vmem:[#allocation6 + $0x28] sm:$0xff]   ;;  %s4159_s18 = scalar_lea.vmem [#allocation11], %s2480_s22  ;;  %s2513_s22 = sshll.u32 %s3061_s17, 12 }
  0x69   : > { %2952 = vsyncadd (%p4367_p2), [#allocation10], 4294966272  ;;  %429 = vst [vmem:[#allocation2 + $0x30] sm:$0xff] %v2981_v0  ;;  %2562 = vmatprep.subr.bf16.mxu0 %v2742_v1  ;;  %v2745_v4 = vld [vmem:[#allocation6 + $0x20] sm:$0xff]   ;;  %v478_v6 = vld [vmem:[%s3181_s11 + $0x8] sm:$0xff]  ;;  %s2368_s24 = sshll.u32 %s4159_s18, 4  ;;  %s4285_s23 = scalar_lea.hbm %s4343_s10, %s2513_s22  ;;  %s4287_s24 = int_to_ptr.vmem [resolvable:$true] %s2368_s24 }
  0x6a   : > { %430 = vst [vmem:[#allocation2 + $0x38] sm:$0xff] %v2981_v0  ;;  %423 = vst [vmem:[#allocation2] sm:$0xff] %v2981_v0  ;;  %2563 = vmatpush3.bf16.msra.mxu0 %v2742_v1  ;;  %v477_v5 = vld [vmem:[%s3181_s11] sm:$0xff]  ;;  %v2746_v8 = vld [vmem:[#allocation6 + $0x18] sm:$0xff]   ;;  %v960_v1 = vlaneseq  ;;  %s2355_s17 = scalar_lea.sflag [#allocation5], %s3175_s7  ;;  %s2899_s4 = scalar_lea.vmem %s4287_s24, 4096 }
  0x6b   : > { %424 = vst [vmem:[#allocation2 + $0x8] sm:$0xff] %v2981_v0  ;;  %425 = vst [vmem:[#allocation2 + $0x10] sm:$0x3] %v2981_v0  ;;  %2564 = vmatprep.subr.bf16.mxu0 %v2743_v2  ;;  %v509_v7 = vpack.c.bf16 %v478_v6, %v477_v5  ;;  %v2747_v9 = vld [vmem:[#allocation6 + $0x10] sm:$0xff]   ;;  %v2748_v10 = vld [vmem:[#allocation6 + $0x8] sm:$0xff]   ;;  %p2900_p4 = scmp.ne.s32.totalorder %s4287_s24, %s2899_s4  ;;  %p4368_p6 = scmp.ne.s32.totalorder %s4360_s25, 0 }
  0x6c   : > { %426 = vst [vmem:[#allocation2 + $0x18] sm:$0xff] %v2981_v0  ;;  %427 = vst [vmem:[#allocation2 + $0x20] sm:$0xff] %v2981_v0  ;;  %v2749_v11 = vld [vmem:[#allocation6] sm:$0xff]   ;;  %v479_v12 = vld [vmem:[%s3181_s11 + $0x10] sm:$0xff]  ;;  %s2982_s30 = smov [#allocation11]  }
  0x6d   : > { %428 = vst [vmem:[#allocation2 + $0x28] sm:$0x3] %v2981_v0  ;;  %431 = vst [vmem:[#allocation2 + $0x40] sm:$0x3] %v2981_v0  ;;  %2578 = vmatprep.mubr.bf16.mxu0 %v509_v7  ;;  %v480_v13 = vld [vmem:[%s3181_s11 + $0x18] sm:$0xff]  ;;  %v481_v14 = vld [vmem:[%s3181_s11 + $0x20] sm:$0xff]  ;;  %p2901_p12 = pnand %p2900_p4, %p4368_p6 }
  0x6e   : > { %432 = vst [vmem:[#allocation2 + $0x48] sm:$0xff] %v2981_v0  ;;  %433 = vst [vmem:[#allocation2 + $0x50] sm:$0xff] %v2981_v0  ;;  %2565 = vmatpush3.bf16.msra.mxu0 %v2743_v2  ;;  %v482_v15 = vld [vmem:[%s3181_s11 + $0x28] sm:$0xff]  ;;  %v510_v16 = vpack.c.bf16 %v480_v13, %v479_v12  ;;  %v483_v18 = vld [vmem:[%s3181_s11 + $0x30] sm:$0xff]  ;;  %v961_v2 = vshrl.u32 %v960_v1, 7  ;;  %s2903_s28 = sshll.u32 %s2982_s30, 4  ;;  %s2904_s28 = int_to_ptr.vmem [resolvable:$false] %s2903_s28 }
  0x6f   : > { %434 = vst [vmem:[#allocation2 + $0x58] sm:$0x3] %v2981_v0  ;;  %435 = vst [vmem:[#allocation2 + $0x60] sm:$0xff] %v2981_v0  ;;  %2566 = vmatprep.subr.bf16.mxu0 %v2744_v3  ;;  %v511_v17 = vpack.c.bf16 %v482_v15, %v481_v14  ;;  %v484_v19 = vld [vmem:[%s3181_s11 + $0x38] sm:$0xff]  ;;  %v485_v20 = vld [vmem:[%s3181_s11 + $0x40] sm:$0xff]  ;;  %p2902_p0 = pneg %p2901_p12  ;;  %s2905_s1 = scalar_lea.vmem %s2904_s28, 8192 }
  0x70   : > { %436 = vst [vmem:[#allocation2 + $0x68] sm:$0xff] %v2981_v0  ;;  %437 = vst [vmem:[#allocation2 + $0x70] sm:$0x3] %v2981_v0  ;;  %v486_v21 = vld [vmem:[%s3181_s11 + $0x48] sm:$0xff]  ;;  %v512_v22 = vpack.c.bf16 %v484_v19, %v483_v18  ;;  %v487_v24 = vld [vmem:[%s3181_s11 + $0x50] sm:$0xff]  ;;  %p2906_p5 = scmp.lt.s32.totalorder %s4287_s24, %s2904_s28  ;;  %p2907_p3 = scmp.lt.s32.totalorder %s2905_s1, %s2899_s4 }
  0x71   : > { %438 = vst [vmem:[#allocation2 + $0x78] sm:$0xff] %v2981_v0  ;;  %439 = vst [vmem:[#allocation2 + $0x80] sm:$0xff] %v2981_v0  ;;  %v513_v23 = vpack.c.bf16 %v486_v21, %v485_v20  ;;  %v488_v25 = vld [vmem:[%s3181_s11 + $0x58] sm:$0xff]  ;;  %v489_v26 = vld [vmem:[%s3181_s11 + $0x60] sm:$0xff] }
  0x72   : > { %440 = vst [vmem:[#allocation2 + $0x88] sm:$0x3] %v2981_v0  ;;  %441 = vst [vmem:[#allocation2 + $0x90] sm:$0xff] %v2981_v0  ;;  %2567 = vmatpush3.bf16.msra.mxu0 %v2744_v3  ;;  %v490_v27 = vld [vmem:[%s3181_s11 + $0x68] sm:$0xff]  ;;  %v514_v28 = vpack.c.bf16 %v488_v25, %v487_v24  ;;  %v491_v30 = vld [vmem:[%s3181_s11 + $0x70] sm:$0xff]  ;;  %v962_v3 = vsub.s32 0, %v961_v2  ;;  %p2908_p7 = por %p2907_p3, %p2906_p5 }
  0x73   : > { %442 = vst [vmem:[#allocation2 + $0x98] sm:$0xff] %v2981_v0  ;;  %443 = vst [vmem:[#allocation2 + $0xa0] sm:$0x3] %v2981_v0  ;;  %2568 = vmatprep.subr.bf16.mxu0 %v2745_v4  ;;  %v515_v29 = vpack.c.bf16 %v490_v27, %v489_v26  ;;  %v492_v31 = vld [vmem:[%s3181_s11 + $0x78] sm:$0xff]  ;;  %v493_v32 = vld [vmem:[%s3181_s11 + $0x80] sm:$0xff] }
  0x74   : > { %444 = vst [vmem:[#allocation2 + $0xa8] sm:$0xff] %v2981_v0  ;;  %445 = vst [vmem:[#allocation2 + $0xb0] sm:$0xff] %v2981_v0  ;;  %v494_v33 = vld [vmem:[%s3181_s11 + $0x88] sm:$0xff]  ;;  %v516_v34 = vpack.c.bf16 %v492_v31, %v491_v30  ;;  %v495_v36 = vld [vmem:[%s3181_s11 + $0x90] sm:$0xff]  ;;  %p2909_p9 = pnand %p2908_p7, %p2902_p0 }
  0x75   : > { %446 = vst [vmem:[#allocation2 + $0xb8] sm:$0x3] %v2981_v0  ;;  %447 = vst [vmem:[#allocation2 + $0xc0] sm:$0xff] %v2981_v0  ;;  %v517_v35 = vpack.c.bf16 %v494_v33, %v493_v32  ;;  %v496_v37 = vld [vmem:[%s3181_s11 + $0x98] sm:$0xff]  ;;  %v497_v38 = vld [vmem:[%s3181_s11 + $0xa0] sm:$0xff] }
  0x76   : > { %448 = vst [vmem:[#allocation2 + $0xc8] sm:$0xff] %v2981_v0  ;;  %449 = vst [vmem:[#allocation2 + $0xd0] sm:$0x3] %v2981_v0  ;;  %2569 = vmatpush3.bf16.msra.mxu0 %v2745_v4  ;;  %v498_v39 = vld [vmem:[%s3181_s11 + $0xa8] sm:$0xff]  ;;  %v518_v40 = vpack.c.bf16 %v496_v37, %v495_v36  ;;  %v499_v42 = vld [vmem:[%s3181_s11 + $0xb0] sm:$0xff]  ;;  %v1062_v4 = vsub.s32 1, %v961_v2 }
  0x77   : > { %450 = vst [vmem:[#allocation2 + $0xd8] sm:$0xff] %v2981_v0  ;;  %451 = vst [vmem:[#allocation2 + $0xe0] sm:$0xff] %v2981_v0  ;;  %2570 = vmatprep.subr.bf16.mxu0 %v2746_v8  ;;  %v519_v41 = vpack.c.bf16 %v498_v39, %v497_v38  ;;  %v500_v43 = vld [vmem:[%s3181_s11 + $0xb8] sm:$0xff]  ;;  %v501_v44 = vld [vmem:[%s3181_s11 + $0xc0] sm:$0xff] }
  0x78   : > { %452 = vst [vmem:[#allocation2 + $0xe8] sm:$0x3] %v2981_v0  ;;  %453 = vst [vmem:[#allocation2 + $0xf0] sm:$0xff] %v2981_v0  ;;  %v502_v45 = vld [vmem:[%s3181_s11 + $0xc8] sm:$0xff]  ;;  %v520_v46 = vpack.c.bf16 %v500_v43, %v499_v42  ;;  %v503_v48 = vld [vmem:[%s3181_s11 + $0xd0] sm:$0xff] }
  0x79   : > { %454 = vst [vmem:[#allocation2 + $0xf8] sm:$0xff] %v2981_v0  ;;  %455 = vst [vmem:[#allocation2 + $0x100] sm:$0x3] %v2981_v0  ;;  %v521_v47 = vpack.c.bf16 %v502_v45, %v501_v44  ;;  %v504_v49 = vld [vmem:[%s3181_s11 + $0xd8] sm:$0xff]  ;;  %v505_v50 = vld [vmem:[%s3181_s11 + $0xe0] sm:$0xff] }
  0x7a   : > { %456 = vst [vmem:[#allocation2 + $0x108] sm:$0xff] %v2981_v0  ;;  %457 = vst [vmem:[#allocation2 + $0x110] sm:$0xff] %v2981_v0  ;;  %2571 = vmatpush3.bf16.msra.mxu0 %v2746_v8  ;;  %v506_v51 = vld [vmem:[%s3181_s11 + $0xe8] sm:$0xff]  ;;  %v522_v52 = vpack.c.bf16 %v504_v49, %v503_v48  ;;  %v507_v54 = vld [vmem:[%s3181_s11 + $0xf0] sm:$0xff]  ;;  %v1162_v8 = vsub.s32 2, %v961_v2 }
  0x7b   : > { %458 = vst [vmem:[#allocation2 + $0x118] sm:$0x3] %v2981_v0  ;;  %459 = vst [vmem:[#allocation2 + $0x120] sm:$0xff] %v2981_v0  ;;  %2572 = vmatprep.subr.bf16.mxu0 %v2747_v9  ;;  %v523_v53 = vpack.c.bf16 %v506_v51, %v505_v50  ;;  %v508_v55 = vld [vmem:[%s3181_s11 + $0xf8] sm:$0xff]  ;;  %v2750_v57 = vld [vmem:[#allocation9 + $0x38] sm:$0xff]  }
  0x7c   : > { %460 = vst [vmem:[#allocation2 + $0x128] sm:$0xff] %v2981_v0  ;;  %461 = vst [vmem:[#allocation2 + $0x130] sm:$0x3] %v2981_v0  ;;  %v524_v56 = vpack.c.bf16 %v508_v55, %v507_v54  ;;  %2610 = vmatprep.subr.bf16.mxu1 %v2750_v57  ;;  %v2751_v58 = vld [vmem:[#allocation9 + $0x30] sm:$0xff]   ;;  %v2752_v59 = vld [vmem:[#allocation9 + $0x28] sm:$0xff]  }
  0x7d   : > { %462 = vst [vmem:[#allocation2 + $0x138] sm:$0xff] %v2981_v0  ;;  %463 = vst [vmem:[#allocation2 + $0x140] sm:$0xff] %v2981_v0  ;;  %2611 = vmatpush3.bf16.msra.mxu1 %v2750_v57  ;;  %v2753_v60 = vld [vmem:[#allocation9 + $0x20] sm:$0xff]   ;;  %v2754_v61 = vld [vmem:[#allocation9 + $0x18] sm:$0xff]  }
  0x7e   : > { %464 = vst [vmem:[#allocation2 + $0x148] sm:$0x3] %v2981_v0  ;;  %465 = vst [vmem:[#allocation2 + $0x150] sm:$0xff] %v2981_v0  ;;  %2573 = vmatpush3.bf16.msra.mxu0 %v2747_v9  ;;  %2612 = vmatprep.subr.bf16.mxu1 %v2751_v58  ;;  %v2755_v62 = vld [vmem:[#allocation9 + $0x10] sm:$0xff]   ;;  %v2756_v63 = vld [vmem:[#allocation9 + $0x8] sm:$0xff]  }
  0x7f   : > { %466 = vst [vmem:[#allocation2 + $0x158] sm:$0xff] %v2981_v0  ;;  %467 = vst [vmem:[#allocation2 + $0x160] sm:$0x3] %v2981_v0  ;;  %2574 = vmatprep.subr.bf16.mxu0 %v2748_v10  ;;  %v925_v5 = vld [vmem:[#allocation8] sm:$0x7]  ;;  %v1028_v9 = vld [vmem:[#allocation2 + $0x1] sm:$0xff] }
  0x80   : > { %468 = vst [vmem:[#allocation2 + $0x168] sm:$0xff] %v2981_v0  ;;  %469 = vst [vmem:[#allocation2 + $0x170] sm:$0xff] %v2981_v0  ;;  %v3230_v6 = vld [vmem:[%s4335_s2] ss:$0 sm:$0xff]  ;;  %v3232_v7 = vrot.slane %v925_v5, %v962_v3  ;;  %v3239_v12 = vrot.slane %v925_v5, %v1062_v4  ;;  %v1029_v14 = vld [vmem:[#allocation2 + $0x9] sm:$0xff]  ;;  %v3244_v18 = vrot.slane %v925_v5, %v1162_v8 }
  0x81   : > { %470 = vst [vmem:[#allocation2 + $0x178] sm:$0x3] %v2981_v0  ;;  %471 = vst [vmem:[#allocation2 + $0x180] sm:$0xff] %v2981_v0  ;;  %2613 = vmatpush3.bf16.msra.mxu1 %v2751_v58  ;;  %v1128_v21 = vld [vmem:[#allocation2 + $0x2] sm:$0xff]  ;;  %v926_v27 = vld [vmem:[#allocation8 + $0x4] sm:$0x7] }
  0x82   : > { %472 = vst [vmem:[#allocation2 + $0x188] sm:$0xff] %v2981_v0  ;;  %473 = vst [vmem:[#allocation2 + $0x190] sm:$0x3] %v2981_v0  ;;  %2575 = vmatpush3.bf16.msra.mxu0 %v2748_v10  ;;  %2614 = vmatprep.subr.bf16.mxu1 %v2752_v59  ;;  %v1164_v32 = vmul.f32 %v3244_v18, %v1128_v21  ;;  %v3263_v48 = vrot.slane %v926_v27, %v962_v3 }
  0x83   : > { %474 = vst [vmem:[#allocation2 + $0x198] sm:$0xff] %v2981_v0  ;;  %475 = vst [vmem:[#allocation2 + $0x1a0] sm:$0xff] %v2981_v0  ;;  %2576 = vmatprep.subr.bf16.mxu0 %v2749_v11  ;;  %v3265_v49 = vrot.slane %v926_v27, %v1162_v8 }
  0x84   : > { %476 = vst [vmem:[#allocation2 + $0x1a8] sm:$0x3] %v2981_v0  ;;  %v2757_v0 = vld [vmem:[#allocation9] sm:$0xff]  }
  0x85   : > { %2615 = vmatpush3.bf16.msra.mxu1 %v2752_v59 }
  0x86   : > { %2577 = vmatpush3.bf16.msra.mxu0 %v2749_v11  ;;  %2616 = vmatprep.subr.bf16.mxu1 %v2753_v60  ;;  %v3237_v11 = vld [vmem:[%s4336_s3] ss:$0 sm:$0xff] }
  0x89   : > { %2579 = vmatmul.mubr.bf16.vlgmr.msra.gmra.mxu0 %v510_v16  ;;  %2617 = vmatpush3.bf16.msra.mxu1 %v2753_v60  ;;  %v964_v16 = vmul.f32 0.0, %v3232_v7 }
  0x8a   : > { %2582 = vmatprep.mubr.bf16.mxu0 %v511_v17  ;;  %2618 = vmatprep.subr.bf16.mxu1 %v2754_v61  ;;  %v1064_v17 = vmul.f32 %v3239_v12, %v1028_v9 }
  0x8c   : > { %v1096_v31 = vadd.f32 %v1064_v17, %v964_v16 }
  0x8d   : > { %2619 = vmatpush3.bf16.msra.mxu1 %v2754_v61 }
  0x8e   : > { %2620 = vmatprep.subr.bf16.mxu1 %v2755_v62 }
  0x91   : > { %2583 = vmatmul.mubr.bf16.gmra.mxu0 %v512_v22  ;;  %2621 = vmatpush3.bf16.msra.mxu1 %v2755_v62 }
  0x92   : > { %2586 = vmatprep.mubr.bf16.mxu0 %v513_v23  ;;  %2622 = vmatprep.subr.bf16.mxu1 %v2756_v63  ;;  %v1065_v23 = vmul.f32 %v3239_v12, %v1029_v14 }
  0x94   : > { %v1097_v38 = vadd.f32 %v1065_v23, %v964_v16 }
  0x95   : > { %2623 = vmatpush3.bf16.msra.mxu1 %v2756_v63 }
  0x96   : > { %2624 = vmatprep.subr.bf16.mxu1 %v2757_v0 }
  0x99   : > { %2587 = vmatmul.mubr.bf16.gmra.mxu0 %v514_v28  ;;  %2625 = vmatpush3.bf16.msra.mxu1 %v2757_v0  ;;  %v927_v28 = vld [vmem:[#allocation8 + $0x8] sm:$0x7] }
  0x9a   : > { %2590 = vmatprep.mubr.bf16.mxu0 %v515_v29  ;;  %v1129_v29 = vld [vmem:[#allocation2 + $0xa] sm:$0xff]  ;;  %v3267_v50 = vrot.slane %v927_v28, %v962_v3  ;;  %v3276_v58 = vrot.slane %v927_v28, %v1162_v8 }
  0x9b   : > { %v1165_v39 = vmul.f32 %v3244_v18, %v1129_v29 }
  0xa1   : > { %2591 = vmatmul.mubr.bf16.gmra.mxu0 %v516_v34 }
  0xa2   : > { %2594 = vmatprep.mubr.bf16.mxu0 %v517_v35 }
  0xa9   : > { %2595 = vmatmul.mubr.bf16.gmra.mxu0 %v518_v40  ;;  %v3255_v40 = vrot.slane %v926_v27, %v1062_v4 }
  0xaa   : > { %2598 = vmatprep.mubr.bf16.mxu0 %v519_v41  ;;  %v3257_v41 = vrot.slane %v927_v28, %v1062_v4 }
  0xb1   : > { %2599 = vmatmul.mubr.bf16.gmra.mxu0 %v520_v46 }
  0xb2   : > { %2602 = vmatprep.mubr.bf16.mxu0 %v521_v47  ;;  %v3261_v47 = vadd.f32 %v1164_v32, %v1096_v31 }
  0xb9   : > { %2603 = vmatmul.mubr.bf16.gmra.mxu0 %v522_v52 }
  0xba   : > { %2606 = vmatprep.mubr.bf16.mxu0 %v523_v53 }
  0xc1   : > { %2607 = vmatmul.mubr.bf16.gmra.mxu0 %v524_v56  ;;  %v3271_v56 = vadd.f32 %v1165_v39, %v1097_v38 }
 0x149   : > { %v2580_v10 = vpop.f32.mrf.mxu0 }
 0x14a   : > { %v759_v13 = vmul.f32 %v2580_v10, %v3230_v6 }
 0x14b   : > { %v623_v15 = vpop.f32.mrf.mxu0 }
 0x14c   : > { %v798_v19 = vadd.f32 %v3237_v11, %v759_v13  ;;  %v757_v20 = vmul.f32 %v3230_v6, %v623_v15 }
 0x14d   : > { %v2581_v22 = vpop.f32.mrf.mxu0 }
 0x14e   : > { %v830_v24 = vmax.f32 %v798_v19, 0.0  ;;  %v796_v25 = vadd.f32 %v3237_v11, %v757_v20  ;;  %v760_v26 = vmul.f32 %v2581_v22, %v3230_v6 }
 0x14f   : > { %v626_v30 = vpop.f32.mrf.mxu0 }
 0x150   : > { %v862_v33 = vmin.f32 %v830_v24, 6.0  ;;  %v828_v34 = vmax.f32 %v796_v25, 0.0  ;;  %v799_v35 = vadd.f32 %v3237_v11, %v760_v26  ;;  %v758_v36 = vmul.f32 %v3230_v6, %v626_v30 }
 0x151   : > { %v2584_v37 = vpop.f32.mrf.mxu0 }
 0x152   : > { %895 = vst [vmem:[#allocation2 + $0x31] sm:$0xff] %v862_v33  ;;  %v860_v42 = vmin.f32 %v828_v34, 6.0  ;;  %v831_v43 = vmax.f32 %v799_v35, 0.0  ;;  %v797_v44 = vadd.f32 %v3237_v11, %v758_v36  ;;  %v763_v45 = vmul.f32 %v2584_v37, %v3230_v6 }
 0x153   : > { %v639_v46 = vpop.f32.mrf.mxu0  ;;  %v3274_v57 = vmul.f32 %v3257_v41, %v862_v33  ;;  %v3279_v59 = vmul.f32 %v3255_v40, %v862_v33  ;;  %v1068_v4 = vmul.f32 %v3239_v12, %v862_v33 }
 0x154   : > { %893 = vst [vmem:[#allocation2 + $0x19] sm:$0xff] %v860_v42  ;;  %v863_v51 = vmin.f32 %v831_v43, 6.0  ;;  %v829_v52 = vmax.f32 %v797_v44, 0.0  ;;  %v802_v53 = vadd.f32 %v3237_v11, %v763_v45  ;;  %v761_v54 = vmul.f32 %v3230_v6, %v639_v46 }
 0x155   : > { %v2585_v55 = vpop.f32.mrf.mxu0  ;;  %v1364_v1 = vmul.f32 %v3255_v40, %v860_v42  ;;  %v3288_v3 = vmul.f32 %v3239_v12, %v860_v42 }
 0x156   : > { %896 = vst [vmem:[#allocation2 + $0x39] sm:$0xff] %v863_v51  ;;  %v861_v60 = vmin.f32 %v829_v52, 6.0  ;;  %v834_v61 = vmax.f32 %v802_v53, 0.0  ;;  %v800_v62 = vadd.f32 %v3237_v11, %v761_v54  ;;  %v764_v63 = vmul.f32 %v2585_v55, %v3230_v6 }
 0x157   : > { %v642_v0 = vpop.f32.mrf.mxu0  ;;  %v3285_v2 = vmul.f32 %v3257_v41, %v863_v51  ;;  %v3302_v17 = vmul.f32 %v3255_v40, %v863_v51  ;;  %v3305_v19 = vmul.f32 %v3239_v12, %v863_v51 }
 0x158   : > { %894 = vst [vmem:[#allocation2 + $0x21] sm:$0xff] %v861_v60  ;;  %v3291_v5 = vmin.f32 %v834_v61, 6.0  ;;  %v832_v8 = vmax.f32 %v800_v62, 0.0  ;;  %v803_v9 = vadd.f32 %v3237_v11, %v764_v63  ;;  %v762_v10 = vmul.f32 %v3230_v6, %v642_v0 }
 0x159   : > { %v2588_v13 = vpop.f32.mrf.mxu0  ;;  %v3296_v14 = vmul.f32 %v3255_v40, %v861_v60  ;;  %v1529_v15 = vld [vmem:[#allocation2 + $0x30] sm:$0xff]  ;;  %v3299_v16 = vmul.f32 %v3239_v12, %v861_v60 }
 0x15a   : > { %899 = vst [vmem:[#allocation2 + $0x61] sm:$0xff] %v3291_v5  ;;  %v3308_v20 = vmin.f32 %v832_v8, 6.0  ;;  %v835_v21 = vmax.f32 %v803_v9, 0.0  ;;  %v801_v22 = vadd.f32 %v3237_v11, %v762_v10  ;;  %v767_v23 = vmul.f32 %v2588_v13, %v3230_v6 }
 0x15b   : > { %v655_v24 = vpop.f32.mrf.mxu0  ;;  %v1228_v25 = vld [vmem:[#allocation2 + $0x18] sm:$0xff]  ;;  %v1565_v26 = vmul.f32 %v3267_v50, %v1529_v15  ;;  %v3314_v27 = vmul.f32 %v1529_v15, %v3263_v48  ;;  %v968_v28 = vmul.f32 %v1529_v15, %v3232_v7  ;;  %v3319_v29 = vmul.f32 %v3257_v41, %v3291_v5 }
 0x15c   : > { %897 = vst [vmem:[#allocation2 + $0x49] sm:$0xff] %v3308_v20  ;;  %v3322_v30 = vmin.f32 %v835_v21, 6.0  ;;  %v833_v31 = vmax.f32 %v801_v22, 0.0  ;;  %v806_v32 = vadd.f32 %v3237_v11, %v767_v23  ;;  %v765_v33 = vmul.f32 %v3230_v6, %v655_v24 }
 0x15d   : > { %v2589_v34 = vpop.f32.mrf.mxu0  ;;  %v1264_v35 = vmul.f32 %v3263_v48, %v1228_v25  ;;  %v3327_v36 = vld [vmem:[#allocation2 + $0x38] sm:$0xff]  ;;  %v966_v39 = vmul.f32 %v1228_v25, %v3232_v7  ;;  %v3336_v42 = vmul.f32 %v3257_v41, %v3308_v20  ;;  %v3338_v43 = vadd.f32 %v1068_v4, %v968_v28 }
 0x15e   : > { %v3329_v37 = vld [vmem:[#allocation2 + $0x32] sm:$0xff]  ;;  %v3331_v38 = vld [vmem:[#allocation2 + $0x3a] sm:$0xff]  ;;  %900 = vst [vmem:[#allocation2 + $0x69] sm:$0xff] %v3322_v30  ;;  %v3341_v44 = vmin.f32 %v833_v31, 6.0  ;;  %v838_v45 = vmax.f32 %v806_v32, 0.0  ;;  %v804_v46 = vadd.f32 %v3237_v11, %v765_v33  ;;  %v768_v51 = vmul.f32 %v2589_v34, %v3230_v6 }
 0x15f   : > { %v658_v52 = vpop.f32.mrf.mxu0  ;;  %v1229_v53 = vld [vmem:[#allocation2 + $0x20] sm:$0xff]  ;;  %v1296_v54 = vadd.f32 %v1264_v35, %v3261_v47  ;;  %v1566_v61 = vmul.f32 %v3267_v50, %v3327_v36  ;;  %v1765_v62 = vmul.f32 %v3276_v58, %v3329_v37  ;;  %v3352_v63 = vmul.f32 %v3276_v58, %v3331_v38 }
 0x160   : > { %v1428_v55 = vld [vmem:[#allocation2 + $0x1a] sm:$0xff]  ;;  %v1429_v60 = vld [vmem:[#allocation2 + $0x22] sm:$0xff]  ;;  %898 = vst [vmem:[#allocation2 + $0x51] sm:$0xff] %v3341_v44  ;;  %v3355_v0 = vmin.f32 %v838_v45, 6.0  ;;  %v836_v4 = vmax.f32 %v804_v46, 0.0  ;;  %v807_v8 = vadd.f32 %v3237_v11, %v768_v51  ;;  %v766_v47 = vmul.f32 %v3230_v6, %v658_v52 }
 0x161   : > { %v2592_v9 = vpop.f32.mrf.mxu0  ;;  %v1265_v10 = vmul.f32 %v3263_v48, %v1229_v53  ;;  %v1396_v13 = vadd.f32 %v1364_v1, %v1296_v54  ;;  %v1464_v15 = vmul.f32 %v3265_v49, %v1428_v55  ;;  %v1465_v21 = vmul.f32 %v3265_v49, %v1429_v60 }
 0x162   : > { %903 = vst [vmem:[#allocation2 + $0x91] sm:$0xff] %v3355_v0  ;;  %v3363_v22 = vmin.f32 %v836_v4, 6.0  ;;  %v839_v23 = vmax.f32 %v807_v8, 0.0  ;;  %v805_v24 = vadd.f32 %v3237_v11, %v766_v47  ;;  %v771_v25 = vmul.f32 %v2592_v9, %v3230_v6 }
 0x163   : > { %v671_v28 = vpop.f32.mrf.mxu0  ;;  %v1297_v31 = vadd.f32 %v1265_v10, %v3271_v56  ;;  %v1496_v32 = vadd.f32 %v1464_v15, %v1396_v13  ;;  %v967_v33 = vmul.f32 %v1229_v53, %v3232_v7  ;;  %v1098_v1 = vadd.f32 %v3288_v3, %v966_v39 }
 0x164   : > { %901 = vst [vmem:[#allocation2 + $0x79] sm:$0xff] %v3363_v22  ;;  %v3371_v34 = vmin.f32 %v839_v23, 6.0  ;;  %v837_v35 = vmax.f32 %v805_v24, 0.0  ;;  %v810_v45 = vadd.f32 %v3237_v11, %v771_v25  ;;  %v769_v46 = vmul.f32 %v3230_v6, %v671_v28  ;;  %v3391_v23 = vld [vmem:[%s4338_s5] ss:$0 sm:$0xff] }
 0x165   : > { %v2593_v51 = vpop.f32.mrf.mxu0  ;;  %v1397_v52 = vadd.f32 %v3296_v14, %v1297_v31  ;;  %v1597_v54 = vadd.f32 %v1565_v26, %v1496_v32  ;;  %v1099_v56 = vadd.f32 %v3299_v16, %v967_v33  ;;  %v1166_v4 = vmul.f32 %v1428_v55, %v3244_v18 }
 0x166   : > { %904 = vst [vmem:[#allocation2 + $0x99] sm:$0xff] %v3371_v34  ;;  %v3379_v3 = vmin.f32 %v837_v35, 6.0  ;;  %v842_v39 = vmax.f32 %v810_v45, 0.0  ;;  %v808_v53 = vadd.f32 %v3237_v11, %v769_v46  ;;  %v772_v8 = vmul.f32 %v2593_v51, %v3230_v6 }
 0x167   : > { %v674_v47 = vpop.f32.mrf.mxu0  ;;  %v1497_v9 = vadd.f32 %v1465_v21, %v1397_v52  ;;  %v1697_v10 = vadd.f32 %v3274_v57, %v1597_v54  ;;  %v1167_v14 = vmul.f32 %v1429_v60, %v3244_v18  ;;  %v1198_v26 = vadd.f32 %v1166_v4, %v1098_v1  ;;  %v3402_v1 = vld [vmem:[%s4339_s6] ss:$0 sm:$0xff] }
 0x168   : > { %902 = vst [vmem:[#allocation2 + $0x81] sm:$0xff] %v3379_v3  ;;  %v874_v16 = vmin.f32 %v842_v39, 6.0  ;;  %v840_v55 = vmax.f32 %v808_v53, 0.0  ;;  %v811_v13 = vadd.f32 %v3237_v11, %v772_v8  ;;  %v770_v15 = vmul.f32 %v3230_v6, %v674_v47 }
 0x169   : > { %v2596_v24 = vpop.f32.mrf.mxu0  ;;  %v1598_v21 = vadd.f32 %v1566_v61, %v1497_v9  ;;  %v1797_v25 = vadd.f32 %v1765_v62, %v1697_v10  ;;  %v1199_v57 = vadd.f32 %v1167_v14, %v1099_v56  ;;  %v1267_v60 = vmul.f32 %v3327_v36, %v3263_v48 }
 0x16a   : > { %907 = vst [vmem:[#allocation2 + $0xc1] sm:$0xff] %v874_v16  ;;  %v3395_v28 = vmin.f32 %v840_v55, 6.0  ;;  %v843_v31 = vmax.f32 %v811_v13, 0.0  ;;  %v809_v32 = vadd.f32 %v3237_v11, %v770_v15  ;;  %v775_v33 = vmul.f32 %v2596_v24, %v3230_v6  ;;  %v3426_v24 = vld [vmem:[#allocation2 + $0x48] sm:$0xff] }
 0x16b   : > { %v687_v35 = vpop.f32.mrf.mxu0  ;;  %v1698_v61 = vadd.f32 %v3285_v2, %v1598_v21  ;;  %v1836_v62 = vmul.f32 %v3391_v23, %v1797_v25  ;;  %v1298_v45 = vadd.f32 %v3314_v27, %v1198_v26  ;;  %v1299_v46 = vadd.f32 %v1267_v60, %v1199_v57  ;;  %v3428_v21 = vld [vmem:[#allocation2 + $0x50] sm:$0xff] }
 0x16c   : > { %905 = vst [vmem:[#allocation2 + $0xa9] sm:$0xff] %v3395_v28  ;;  %v875_v51 = vmin.f32 %v843_v31, 6.0  ;;  %v841_v52 = vmax.f32 %v809_v32, 0.0  ;;  %v814_v54 = vadd.f32 %v3237_v11, %v775_v33  ;;  %v773_v56 = vmul.f32 %v3230_v6, %v687_v35 }
 0x16d   : > { %v2597_v4 = vpop.f32.mrf.mxu0  ;;  %v1798_v39 = vadd.f32 %v3352_v63, %v1698_v61  ;;  %v1875_v53 = vadd.f32 %v3402_v1, %v1836_v62  ;;  %v1398_v2 = vadd.f32 %v3279_v59, %v1298_v45  ;;  %v1399_v8 = vadd.f32 %v3302_v17, %v1299_v46  ;;  %v3433_v45 = vld [vmem:[#allocation2 + $0x4a] sm:$0xff] }
 0x16e   : > { %908 = vst [vmem:[#allocation2 + $0xc9] sm:$0xff] %v875_v51  ;;  %v3414_v27 = vmin.f32 %v841_v52, 6.0  ;;  %v846_v47 = vmax.f32 %v814_v54, 0.0  ;;  %v812_v9 = vadd.f32 %v3237_v11, %v773_v56  ;;  %v776_v10 = vmul.f32 %v2597_v4, %v3230_v6 }
 0x16f   : > { %v690_v14 = vpop.f32.mrf.mxu0  ;;  %v1837_v26 = vmul.f32 %v3391_v23, %v1798_v39  ;;  %v1907_v16 = vmax.f32 %v1875_v53, 0.0  ;;  %v1466_v63 = vmul.f32 %v3329_v37, %v3265_v49  ;;  %v1467_v59 = vmul.f32 %v3331_v38, %v3265_v49 }
 0x170   : > { %906 = vst [vmem:[#allocation2 + $0xb1] sm:$0xff] %v3414_v27  ;;  %v878_v17 = vmin.f32 %v846_v47, 6.0  ;;  %v844_v55 = vmax.f32 %v812_v9, 0.0  ;;  %v815_v13 = vadd.f32 %v3237_v11, %v776_v10  ;;  %v774_v15 = vmul.f32 %v3230_v6, %v690_v14 }
 0x171   : > { %v2600_v25 = vpop.f32.mrf.mxu0  ;;  %v1876_v57 = vadd.f32 %v3402_v1, %v1837_v26  ;;  %v1939_v60 = vmin.f32 %v1907_v16, 6.0  ;;  %v1498_v31 = vadd.f32 %v1466_v63, %v1398_v2  ;;  %v1499_v32 = vadd.f32 %v1467_v59, %v1399_v8  ;;  %v3443_v8 = vld [vmem:[#allocation2 + $0x52] sm:$0xff] }
 0x172   : > { %911 = vst [vmem:[#allocation2 + $0xf1] sm:$0xff] %v878_v17  ;;  %v876_v33 = vmin.f32 %v844_v55, 6.0  ;;  %v847_v35 = vmax.f32 %v815_v13, 0.0  ;;  %v813_v61 = vadd.f32 %v3237_v11, %v774_v15  ;;  %v779_v62 = vmul.f32 %v2600_v25, %v3230_v6 }
 0x173   : > { %v703_v46 = vpop.f32.mrf.mxu0  ;;  %v1908_v51 = vmax.f32 %v1876_v57, 0.0  ;;  %v1567_v52 = vmul.f32 %v3267_v50, %v3426_v24  ;;  %v1568_v54 = vmul.f32 %v3267_v50, %v3428_v21  ;;  %v1668_v56 = vmul.f32 %v3257_v41, %v3341_v44 }
 0x174   : > { %909 = vst [vmem:[#allocation2 + $0xd9] sm:$0xff] %v876_v33  ;;  %v879_v4 = vmin.f32 %v847_v35, 6.0  ;;  %v845_v39 = vmax.f32 %v813_v61, 0.0  ;;  %v818_v53 = vadd.f32 %v3237_v11, %v779_v62  ;;  %v777_v2 = vmul.f32 %v3230_v6, %v703_v46 }
 0x175   : > { %v2601_v47 = vpop.f32.mrf.mxu0  ;;  %v1940_v9 = vmin.f32 %v1908_v51, 6.0  ;;  %v1599_v10 = vadd.f32 %v1567_v52, %v1498_v31  ;;  %v1600_v14 = vadd.f32 %v1568_v54, %v1499_v32  ;;  %v1767_v26 = vmul.f32 %v3276_v58, %v3433_v45 }
 0x176   : > { %912 = vst [vmem:[#allocation2 + $0xf9] sm:$0xff] %v879_v4  ;;  %v877_v16 = vmin.f32 %v845_v39, 6.0  ;;  %v850_v63 = vmax.f32 %v818_v53, 0.0  ;;  %v816_v59 = vadd.f32 %v3237_v11, %v777_v2  ;;  %v780_v17 = vmul.f32 %v2601_v47, %v3230_v6 }
 0x177   : > { %v706_v55 = vpop.f32.mrf.mxu0  ;;  %v1971_v13 = vpack.c.bf16 %v1940_v9, %v1939_v60  ;;  %v1699_v15 = vadd.f32 %v3336_v42, %v1599_v10  ;;  %v1700_v25 = vadd.f32 %v1668_v56, %v1600_v14  ;;  %v1768_v57 = vmul.f32 %v3276_v58, %v3443_v8 }
 0x178   : > { %910 = vst [vmem:[#allocation2 + $0xe1] sm:$0xff] %v877_v16  ;;  %v882_v31 = vmin.f32 %v850_v63, 6.0  ;;  %v848_v32 = vmax.f32 %v816_v59, 0.0  ;;  %v819_v33 = vadd.f32 %v3237_v11, %v780_v17  ;;  %v778_v35 = vmul.f32 %v3230_v6, %v706_v55 }
 0x179   : > { %2626 = vmatprep.mubr.bf16.mxu1 %v1971_v13  ;;  %v2604_v61 = vpop.f32.mrf.mxu0  ;;  %v1799_v62 = vadd.f32 %v1767_v26, %v1699_v15  ;;  %v1800_v46 = vadd.f32 %v1768_v57, %v1700_v25  ;;  %v969_v60 = vmul.f32 %v3327_v36, %v3232_v7  ;;  %v1168_v42 = vmul.f32 %v3329_v37, %v3244_v18 }
 0x17a   : > { %915 = vst [vmem:[#allocation2 + $0x121] sm:$0xff] %v882_v31  ;;  %v880_v51 = vmin.f32 %v848_v32, 6.0  ;;  %v851_v52 = vmax.f32 %v819_v33, 0.0  ;;  %v817_v54 = vadd.f32 %v3237_v11, %v778_v35  ;;  %v783_v56 = vmul.f32 %v2604_v61, %v3230_v6 }
 0x17b   : > { %v719_v4 = vpop.f32.mrf.mxu0  ;;  %v1838_v39 = vmul.f32 %v3391_v23, %v1799_v62  ;;  %v1839_v53 = vmul.f32 %v3391_v23, %v1800_v46  ;;  %v1101_v2 = vadd.f32 %v3305_v19, %v969_v60  ;;  %v1169_v36 = vmul.f32 %v3331_v38, %v3244_v18 }
 0x17c   : > { %913 = vst [vmem:[#allocation2 + $0x109] sm:$0xff] %v880_v51  ;;  %v883_v47 = vmin.f32 %v851_v52, 6.0  ;;  %v849_v37 = vmax.f32 %v817_v54, 0.0  ;;  %v822_v9 = vadd.f32 %v3237_v11, %v783_v56  ;;  %v781_v10 = vmul.f32 %v3230_v6, %v719_v4 }
 0x17d   : > { %v1877_v14 = vadd.f32 %v3402_v1, %v1838_v39  ;;  %v1878_v26 = vadd.f32 %v3402_v1, %v1839_v53  ;;  %v2605_v16 = vpop.f32.mrf.mxu0  ;;  %v1200_v63 = vadd.f32 %v1168_v42, %v3338_v43  ;;  %v1201_v59 = vadd.f32 %v1169_v36, %v1101_v2  ;;  %v3478_v42 = vld [vmem:[#allocation2 + $0x60] sm:$0xff]  ;;  %v3483_v39 = vld [vmem:[#allocation2 + $0x68] sm:$0xff] }
 0x17e   : > { %916 = vst [vmem:[#allocation2 + $0x129] sm:$0xff] %v883_v47  ;;  %v881_v19 = vmin.f32 %v849_v37, 6.0  ;;  %v854_v17 = vmax.f32 %v822_v9, 0.0  ;;  %v820_v38 = vadd.f32 %v3237_v11, %v781_v10  ;;  %v784_v55 = vmul.f32 %v2605_v16, %v3230_v6  ;;  %v3485_v53 = vld [vmem:[#allocation2 + $0x62] sm:$0xff]  ;;  %v3493_v9 = vld [vmem:[#allocation2 + $0x6a] sm:$0xff] }
 0x17f   : > { %v1909_v13 = vmax.f32 %v1877_v14, 0.0  ;;  %v1910_v15 = vmax.f32 %v1878_v26, 0.0  ;;  %v722_v25 = vpop.f32.mrf.mxu0  ;;  %v1268_v57 = vmul.f32 %v3426_v24, %v3263_v48  ;;  %v1269_v31 = vmul.f32 %v3428_v21, %v3263_v48 }
 0x180   : > { %914 = vst [vmem:[#allocation2 + $0x111] sm:$0xff] %v881_v19  ;;  %v886_v32 = vmin.f32 %v854_v17, 6.0  ;;  %v852_v43 = vmax.f32 %v820_v38, 0.0  ;;  %v823_v33 = vadd.f32 %v3237_v11, %v784_v55  ;;  %v782_v35 = vmul.f32 %v3230_v6, %v722_v25 }
 0x181   : > { %v1941_v61 = vmin.f32 %v1909_v13, 6.0  ;;  %v1942_v62 = vmin.f32 %v1910_v15, 6.0  ;;  %v1300_v46 = vadd.f32 %v1268_v57, %v1200_v63  ;;  %v1301_v60 = vadd.f32 %v1269_v31, %v1201_v59  ;;  %v2608_v51 = vpop.f32.mrf.mxu0 }
 0x182   : > { %919 = vst [vmem:[#allocation2 + $0x151] sm:$0xff] %v886_v32  ;;  %v884_v52 = vmin.f32 %v852_v43, 6.0  ;;  %v855_v54 = vmax.f32 %v823_v33, 0.0  ;;  %v821_v56 = vadd.f32 %v3237_v11, %v782_v35  ;;  %v1368_v4 = vmul.f32 %v3255_v40, %v3308_v20 }
 0x183   : > { %v1972_v2 = vpack.c.bf16 %v1942_v62, %v1941_v61  ;;  %v1369_v36 = vmul.f32 %v3255_v40, %v3341_v44  ;;  %v1468_v47 = vmul.f32 %v3433_v45, %v3265_v49  ;;  %v1469_v37 = vmul.f32 %v3443_v8, %v3265_v49  ;;  %v735_v63 = vpop.f32.mrf.mxu0 }
 0x184   : > { %917 = vst [vmem:[#allocation2 + $0x139] sm:$0xff] %v884_v52  ;;  %v887_v10 = vmin.f32 %v855_v54, 6.0  ;;  %v853_v14 = vmax.f32 %v821_v56, 0.0  ;;  %v1400_v26 = vadd.f32 %v1368_v4, %v1300_v46  ;;  %v1569_v16 = vmul.f32 %v3267_v50, %v3478_v42 }
 0x185   : > { %2627 = vmatmul.mubr.bf16.vlgmr.msra.gmra.mxu1 %v1972_v2  ;;  %v1401_v59 = vadd.f32 %v1369_v36, %v1301_v60  ;;  %v1570_v19 = vmul.f32 %v3267_v50, %v3483_v39  ;;  %v1670_v17 = vmul.f32 %v3257_v41, %v3322_v30  ;;  %v1769_v38 = vmul.f32 %v3276_v58, %v3485_v53 }
 0x186   : > { %920 = vst [vmem:[#allocation2 + $0x159] sm:$0xff] %v887_v10  ;;  %v885_v55 = vmin.f32 %v853_v14, 6.0  ;;  %v1500_v13 = vadd.f32 %v1468_v47, %v1400_v26  ;;  %v1770_v15 = vmul.f32 %v3276_v58, %v3493_v9  ;;  %v787_v25 = vmul.f32 %v2608_v51, %v3230_v6  ;;  %v3526_v10 = vld [vmem:[#allocation2 + $0x78] sm:$0xff] }
 0x187   : > { %v1501_v57 = vadd.f32 %v1469_v37, %v1401_v59  ;;  %v785_v31 = vmul.f32 %v3230_v6, %v735_v63  ;;  %v970_v32 = vmul.f32 %v3426_v24, %v3232_v7  ;;  %v971_v43 = vmul.f32 %v3428_v21, %v3232_v7 }
 0x188   : > { %918 = vst [vmem:[#allocation2 + $0x141] sm:$0xff] %v885_v55  ;;  %v1601_v33 = vadd.f32 %v1569_v16, %v1500_v13  ;;  %v826_v35 = vadd.f32 %v3237_v11, %v787_v25  ;;  %v1070_v61 = vmul.f32 %v3239_v12, %v3308_v20  ;;  %v1071_v62 = vmul.f32 %v3239_v12, %v3341_v44  ;;  %v3537_v55 = vld [vmem:[#allocation2 + $0x7a] sm:$0xff]  ;;  %v3539_v13 = vld [vmem:[#allocation2 + $0x82] sm:$0xff] }
 0x189   : > { %v1602_v46 = vadd.f32 %v1570_v19, %v1501_v57  ;;  %v824_v60 = vadd.f32 %v3237_v11, %v785_v31  ;;  %v1170_v51 = vmul.f32 %v3433_v45, %v3244_v18  ;;  %v1171_v24 = vmul.f32 %v3443_v8, %v3244_v18  ;;  %v3528_v8 = vld [vmem:[#allocation2 + $0x80] sm:$0xff] }
 0x18a   : > { %v1701_v21 = vadd.f32 %v3319_v29, %v1601_v33  ;;  %v858_v52 = vmax.f32 %v826_v35, 0.0  ;;  %v1102_v54 = vadd.f32 %v1070_v61, %v970_v32  ;;  %v1103_v56 = vadd.f32 %v1071_v62, %v971_v43  ;;  %v2609_v29 = vpop.f32.mrf.mxu0 }
 0x18b   : > { %v1702_v4 = vadd.f32 %v1670_v17, %v1602_v46  ;;  %v856_v2 = vmax.f32 %v824_v60, 0.0  ;;  %v1270_v20 = vmul.f32 %v3478_v42, %v3263_v48  ;;  %v1271_v44 = vmul.f32 %v3483_v39, %v3263_v48 }
 0x18c   : > { %v1801_v36 = vadd.f32 %v1769_v38, %v1701_v21  ;;  %v890_v47 = vmin.f32 %v858_v52, 6.0  ;;  %v1202_v37 = vadd.f32 %v1170_v51, %v1102_v54  ;;  %v1203_v45 = vadd.f32 %v1171_v24, %v1103_v56  ;;  %v738_v61 = vpop.f32.mrf.mxu0 }
 0x18d   : > { %v1802_v14 = vadd.f32 %v1770_v15, %v1702_v4  ;;  %v888_v26 = vmin.f32 %v856_v2, 6.0  ;;  %v1370_v16 = vmul.f32 %v3255_v40, %v3291_v5  ;;  %v1371_v63 = vmul.f32 %v3255_v40, %v3322_v30 }
 0x18e   : > { %v1840_v59 = vmul.f32 %v3391_v23, %v1801_v36  ;;  %923 = vst [vmem:[#allocation2 + $0x181] sm:$0xff] %v890_v47  ;;  %v1302_v19 = vadd.f32 %v1270_v20, %v1202_v37  ;;  %v1303_v17 = vadd.f32 %v1271_v44, %v1203_v45  ;;  %v1470_v38 = vmul.f32 %v3485_v53, %v3265_v49 }
 0x18f   : > { %v1841_v15 = vmul.f32 %v3391_v23, %v1802_v14  ;;  %921 = vst [vmem:[#allocation2 + $0x169] sm:$0xff] %v888_v26  ;;  %v1471_v25 = vmul.f32 %v3493_v9, %v3265_v49  ;;  %v1571_v57 = vmul.f32 %v3267_v50, %v3526_v10  ;;  %v1572_v31 = vmul.f32 %v3267_v50, %v3528_v8 }
 0x190   : > { %v1879_v32 = vadd.f32 %v3402_v1, %v1840_v59  ;;  %v1402_v43 = vadd.f32 %v1370_v16, %v1302_v19  ;;  %v1403_v33 = vadd.f32 %v1371_v63, %v1303_v17  ;;  %v1671_v35 = vmul.f32 %v3257_v41, %v3363_v22 }
 0x191   : > { %v1880_v62 = vadd.f32 %v3402_v1, %v1841_v15  ;;  %v1672_v46 = vmul.f32 %v3257_v41, %v3379_v3  ;;  %v1771_v60 = vmul.f32 %v3276_v58, %v3537_v55  ;;  %v1772_v51 = vmul.f32 %v3276_v58, %v3539_v13 }
 0x192   : > { %v1911_v24 = vmax.f32 %v1879_v32, 0.0  ;;  %v1502_v21 = vadd.f32 %v1470_v38, %v1402_v43  ;;  %v1503_v52 = vadd.f32 %v1471_v25, %v1403_v33  ;;  %v788_v54 = vmul.f32 %v2609_v29, %v3230_v6 }
 0x193   : > { %v1912_v56 = vmax.f32 %v1880_v62, 0.0  ;;  %v786_v4 = vmul.f32 %v3230_v6, %v738_v61  ;;  %v972_v2 = vmul.f32 %v3478_v42, %v3232_v7  ;;  %v973_v20 = vmul.f32 %v3483_v39, %v3232_v7 }
 0x194   : > { %v1943_v44 = vmin.f32 %v1911_v24, 6.0  ;;  %v1603_v36 = vadd.f32 %v1571_v57, %v1502_v21  ;;  %v1604_v47 = vadd.f32 %v1572_v31, %v1503_v52  ;;  %v827_v37 = vadd.f32 %v3237_v11, %v788_v54 }
 0x195   : > { %v1944_v45 = vmin.f32 %v1912_v56, 6.0  ;;  %v825_v14 = vadd.f32 %v3237_v11, %v786_v4  ;;  %v1072_v29 = vmul.f32 %v3239_v12, %v3291_v5  ;;  %v1073_v6 = vmul.f32 %v3239_v12, %v3322_v30  ;;  %v3598_v56 = vld [vmem:[#allocation2 + $0x9a] sm:$0xff] }
 0x196   : > { %v1703_v26 = vadd.f32 %v1671_v35, %v1603_v36  ;;  %v1704_v16 = vadd.f32 %v1672_v46, %v1604_v47  ;;  %v859_v42 = vmax.f32 %v827_v37, 0.0  ;;  %v1172_v39 = vmul.f32 %v3485_v53, %v3244_v18  ;;  %v3578_v53 = vld [vmem:[#allocation2 + $0x90] sm:$0xff]  ;;  %v3584_v35 = vld [vmem:[#allocation2 + $0x98] sm:$0xff] }
 0x197   : > { %v1973_v63 = vpack.c.bf16 %v1944_v45, %v1943_v44  ;;  %v857_v59 = vmax.f32 %v825_v14, 0.0  ;;  %v1104_v19 = vadd.f32 %v1072_v29, %v972_v2  ;;  %v1105_v17 = vadd.f32 %v1073_v6, %v973_v20 }
 0x198   : > { %v1803_v38 = vadd.f32 %v1771_v60, %v1703_v26  ;;  %v1804_v15 = vadd.f32 %v1772_v51, %v1704_v16  ;;  %v891_v25 = vmin.f32 %v859_v42, 6.0  ;;  %v1173_v11 = vmul.f32 %v3493_v9, %v3244_v18  ;;  %v3592_v51 = vld [vmem:[#allocation2 + $0x92] sm:$0xff] }
 0x199   : > { %2630 = vmatprep.mubr.bf16.mxu1 %v1973_v63  ;;  %v889_v5 = vmin.f32 %v857_v59, 6.0  ;;  %v1204_v57 = vadd.f32 %v1172_v39, %v1104_v19  ;;  %v1272_v30 = vmul.f32 %v3526_v10, %v3263_v48  ;;  %v1273_v31 = vmul.f32 %v3528_v8, %v3263_v48  ;;  %v1338_v39 = vld [vmem:[#allocation2 + $0x91] sm:$0xff] }
 0x19a   : > { %v1842_v32 = vmul.f32 %v3391_v23, %v1803_v38  ;;  %v1843_v43 = vmul.f32 %v3391_v23, %v1804_v15  ;;  %924 = vst [vmem:[#allocation2 + $0x189] sm:$0xff] %v891_v25  ;;  %v1205_v33 = vadd.f32 %v1173_v11, %v1105_v17  ;;  %v1372_v9 = vmul.f32 %v3255_v40, %v3363_v22  ;;  %v1339_v17 = vld [vmem:[#allocation2 + $0x99] sm:$0xff]  ;;  %v3624_v11 = vld [vmem:[#allocation2 + $0xa8] sm:$0xff] }
 0x19b   : > { %922 = vst [vmem:[#allocation2 + $0x171] sm:$0xff] %v889_v5  ;;  %v1304_v61 = vadd.f32 %v1272_v30, %v1204_v57  ;;  %v1373_v62 = vmul.f32 %v3255_v40, %v3379_v3  ;;  %v1472_v46 = vmul.f32 %v3537_v55, %v3265_v49  ;;  %v1473_v60 = vmul.f32 %v3539_v13, %v3265_v49 }
 0x19c   : > { %v1881_v24 = vadd.f32 %v3402_v1, %v1842_v32  ;;  %v1882_v21 = vadd.f32 %v3402_v1, %v1843_v43  ;;  %v1305_v52 = vadd.f32 %v1273_v31, %v1205_v33  ;;  %v1573_v54 = vmul.f32 %v3267_v50, %v3578_v53  ;;  %v3634_v43 = vld [vmem:[#allocation2 + $0xaa] sm:$0xff] }
 0x19d   : > { %v1404_v4 = vadd.f32 %v1372_v9, %v1304_v61  ;;  %v1574_v2 = vmul.f32 %v3267_v50, %v3584_v35  ;;  %v1673_v20 = vmul.f32 %v3257_v41, %v3355_v0  ;;  %v1674_v44 = vmul.f32 %v3257_v41, %v3371_v34 }
 0x19e   : > { %v1913_v36 = vmax.f32 %v1881_v24, 0.0  ;;  %v1914_v47 = vmax.f32 %v1882_v21, 0.0  ;;  %v1405_v37 = vadd.f32 %v1373_v62, %v1305_v52  ;;  %v1773_v45 = vmul.f32 %v3276_v58, %v3592_v51 }
 0x19f   : > { %v1504_v14 = vadd.f32 %v1472_v46, %v1404_v4  ;;  %v1774_v29 = vmul.f32 %v3276_v58, %v3598_v56  ;;  %v974_v6 = vmul.f32 %v3526_v10, %v3232_v7  ;;  %v975_v26 = vmul.f32 %v3528_v8, %v3232_v7  ;;  %v3640_v46 = vld [vmem:[#allocation2 + $0xb2] sm:$0xff] }
 0x1a0   : > { %v1945_v0 = vmin.f32 %v1913_v36, 6.0  ;;  %v1946_v16 = vmin.f32 %v1914_v47, 6.0  ;;  %v1505_v42 = vadd.f32 %v1473_v60, %v1405_v37  ;;  %v1074_v34 = vmul.f32 %v3239_v12, %v3363_v22 }
 0x1a1   : > { %v1605_v63 = vadd.f32 %v1573_v54, %v1504_v14  ;;  %v1075_v59 = vmul.f32 %v3239_v12, %v3379_v3  ;;  %v1174_v19 = vmul.f32 %v3537_v55, %v3244_v18  ;;  %v1175_v10 = vmul.f32 %v3539_v13, %v3244_v18  ;;  %v3629_v55 = vld [vmem:[#allocation2 + $0xb0] sm:$0xff] }
 0x1a2   : > { %v1974_v38 = vpack.c.bf16 %v1946_v16, %v1945_v0  ;;  %v1606_v8 = vadd.f32 %v1574_v2, %v1505_v42  ;;  %v1106_v15 = vadd.f32 %v1074_v34, %v974_v6  ;;  %v1274_v25 = vmul.f32 %v3578_v53, %v3263_v48 }
 0x1a3   : > { %v1705_v22 = vadd.f32 %v1673_v20, %v1605_v63  ;;  %v1107_v5 = vadd.f32 %v1075_v59, %v975_v26  ;;  %v1275_v3 = vmul.f32 %v3584_v35, %v3263_v48  ;;  %v1374_v57 = vmul.f32 %v3255_v40, %v1338_v39  ;;  %v1340_v63 = vld [vmem:[#allocation2 + $0xa9] sm:$0xff] }
 0x1a4   : > { %2631 = vmatmul.mubr.bf16.gmra.mxu1 %v1974_v38  ;;  %v1706_v13 = vadd.f32 %v1674_v44, %v1606_v8  ;;  %v1206_v30 = vadd.f32 %v1174_v19, %v1106_v15  ;;  %v1375_v31 = vmul.f32 %v3255_v40, %v1339_v17  ;;  %v1474_v32 = vmul.f32 %v3592_v51, %v3265_v49 }
 0x1a5   : > { %v1805_v33 = vadd.f32 %v1773_v45, %v1705_v22  ;;  %v1207_v9 = vadd.f32 %v1175_v10, %v1107_v5  ;;  %v1475_v61 = vmul.f32 %v3598_v56, %v3265_v49  ;;  %v1575_v62 = vmul.f32 %v3267_v50, %v3624_v11  ;;  %v1341_v10 = vld [vmem:[#allocation2 + $0xb1] sm:$0xff] }
 0x1a6   : > { %v1806_v60 = vadd.f32 %v1774_v29, %v1706_v13  ;;  %v1306_v24 = vadd.f32 %v1274_v25, %v1206_v30  ;;  %v1576_v21 = vmul.f32 %v3267_v50, %v3629_v55  ;;  %v1675_v52 = vmul.f32 %v3257_v41, %v3395_v28 }
 0x1a7   : > { %v1844_v54 = vmul.f32 %v3391_v23, %v1805_v33  ;;  %v1307_v4 = vadd.f32 %v1275_v3, %v1207_v9  ;;  %v1676_v2 = vmul.f32 %v3257_v41, %v3414_v27  ;;  %v1775_v20 = vmul.f32 %v3276_v58, %v3634_v43  ;;  %v3673_v3 = vld [vmem:[#allocation2 + $0xc8] sm:$0xff] }
 0x1a8   : > { %v1845_v44 = vmul.f32 %v3391_v23, %v1806_v60  ;;  %v1406_v36 = vadd.f32 %v1374_v57, %v1306_v24  ;;  %v1776_v47 = vmul.f32 %v3276_v58, %v3640_v46  ;;  %v976_v37 = vmul.f32 %v3578_v53, %v3232_v7  ;;  %v3680_v33 = vld [vmem:[#allocation2 + $0xc9] sm:$0xff] }
 0x1a9   : > { %v1883_v28 = vadd.f32 %v3402_v1, %v1844_v54  ;;  %v1407_v45 = vadd.f32 %v1375_v31, %v1307_v4  ;;  %v977_v14 = vmul.f32 %v3584_v35, %v3232_v7  ;;  %v1076_v27 = vmul.f32 %v1338_v39, %v3239_v12  ;;  %v3684_v24 = vld [vmem:[#allocation2 + $0xc2] sm:$0xff] }
 0x1aa   : > { %v1884_v29 = vadd.f32 %v3402_v1, %v1845_v44  ;;  %v1506_v6 = vadd.f32 %v1474_v32, %v1406_v36  ;;  %v1077_v26 = vmul.f32 %v1339_v17, %v3239_v12  ;;  %v1176_v0 = vmul.f32 %v3592_v51, %v3244_v18  ;;  %v3678_v32 = vld [vmem:[#allocation2 + $0xc1] sm:$0xff] }
 0x1ab   : > { %v1915_v16 = vmax.f32 %v1883_v28, 0.0  ;;  %v1507_v42 = vadd.f32 %v1475_v61, %v1407_v45  ;;  %v1108_v34 = vadd.f32 %v1076_v27, %v976_v37  ;;  %v1177_v53 = vmul.f32 %v3598_v56, %v3244_v18  ;;  %v3671_v56 = vld [vmem:[#allocation2 + $0xc0] sm:$0xff] }
 0x1ac   : > { %v1916_v59 = vmax.f32 %v1884_v29, 0.0  ;;  %v1607_v19 = vadd.f32 %v1575_v62, %v1506_v6  ;;  %v1109_v35 = vadd.f32 %v1077_v26, %v977_v14  ;;  %v1276_v39 = vmul.f32 %v3624_v11, %v3263_v48 }
 0x1ad   : > { %v1947_v38 = vmin.f32 %v1915_v16, 6.0  ;;  %v1608_v8 = vadd.f32 %v1576_v21, %v1507_v42  ;;  %v1208_v17 = vadd.f32 %v1176_v0, %v1108_v34  ;;  %v1277_v51 = vmul.f32 %v3629_v55, %v3263_v48  ;;  %v3686_v21 = vld [vmem:[#allocation2 + $0xca] sm:$0xff] }
 0x1ae   : > { %v1948_v15 = vmin.f32 %v1916_v59, 6.0  ;;  %v1707_v25 = vadd.f32 %v1675_v52, %v1607_v19  ;;  %v1209_v22 = vadd.f32 %v1177_v53, %v1109_v35  ;;  %v1376_v5 = vmul.f32 %v3255_v40, %v1340_v63 }
 0x1af   : > { %v1708_v57 = vadd.f32 %v1676_v2, %v1608_v8  ;;  %v1308_v13 = vadd.f32 %v1276_v39, %v1208_v17  ;;  %v1377_v30 = vmul.f32 %v3255_v40, %v1341_v10  ;;  %v1476_v31 = vmul.f32 %v3634_v43, %v3265_v49 }
 0x1b0   : > { %v1975_v9 = vpack.c.bf16 %v1948_v15, %v1947_v38  ;;  %v1807_v61 = vadd.f32 %v1775_v20, %v1707_v25  ;;  %v1309_v62 = vadd.f32 %v1277_v51, %v1209_v22  ;;  %v1477_v60 = vmul.f32 %v3640_v46, %v3265_v49 }
 0x1b1   : > { %v1808_v52 = vadd.f32 %v1776_v47, %v1708_v57  ;;  %v1408_v54 = vadd.f32 %v1376_v5, %v1308_v13  ;;  %v1577_v4 = vmul.f32 %v3267_v50, %v3671_v56  ;;  %v1578_v2 = vmul.f32 %v3267_v50, %v3673_v3  ;;  %v3720_v5 = vld [vmem:[#allocation2 + $0xe0] sm:$0xff] }
 0x1b2   : > { %2634 = vmatprep.mubr.bf16.mxu1 %v1975_v9  ;;  %v1846_v44 = vmul.f32 %v3391_v23, %v1807_v61  ;;  %v1409_v20 = vadd.f32 %v1377_v30, %v1309_v62  ;;  %v1677_v36 = vmul.f32 %v3257_v41, %v3678_v32  ;;  %v1678_v37 = vmul.f32 %v3257_v41, %v3680_v33 }
 0x1b3   : > { %v1847_v28 = vmul.f32 %v3391_v23, %v1808_v52  ;;  %v1508_v47 = vadd.f32 %v1476_v31, %v1408_v54  ;;  %v1777_v45 = vmul.f32 %v3276_v58, %v3684_v24  ;;  %v1778_v14 = vmul.f32 %v3276_v58, %v3686_v21  ;;  %v3728_v31 = vld [vmem:[#allocation2 + $0xd9] sm:$0xff]  ;;  %v3731_v52 = vld [vmem:[#allocation2 + $0xe1] sm:$0xff] }
 0x1b4   : > { %v1885_v27 = vadd.f32 %v3402_v1, %v1846_v44  ;;  %v1509_v29 = vadd.f32 %v1477_v60, %v1409_v20  ;;  %v978_v6 = vmul.f32 %v3624_v11, %v3232_v7  ;;  %v979_v26 = vmul.f32 %v3629_v55, %v3232_v7  ;;  %v3733_v54 = vld [vmem:[#allocation2 + $0xda] sm:$0xff] }
 0x1b5   : > { %v1886_v0 = vadd.f32 %v3402_v1, %v1847_v28  ;;  %v1609_v16 = vadd.f32 %v1577_v4, %v1508_v47  ;;  %v1078_v42 = vmul.f32 %v1340_v63, %v3239_v12  ;;  %v1079_v34 = vmul.f32 %v1341_v10, %v3239_v12  ;;  %v3735_v4 = vld [vmem:[#allocation2 + $0xe2] sm:$0xff] }
 0x1b6   : > { %v1917_v53 = vmax.f32 %v1885_v27, 0.0  ;;  %v1610_v59 = vadd.f32 %v1578_v2, %v1509_v29  ;;  %v1178_v19 = vmul.f32 %v3634_v43, %v3244_v18  ;;  %v1179_v35 = vmul.f32 %v3640_v46, %v3244_v18  ;;  %v3718_v43 = vld [vmem:[#allocation2 + $0xd8] sm:$0xff] }
 0x1b7   : > { %v1918_v39 = vmax.f32 %v1886_v0, 0.0  ;;  %v1709_v11 = vadd.f32 %v1677_v36, %v1609_v16  ;;  %v1110_v38 = vadd.f32 %v1078_v42, %v978_v6  ;;  %v1111_v8 = vadd.f32 %v1079_v34, %v979_v26 }
 0x1b8   : > { %v1949_v55 = vmin.f32 %v1917_v53, 6.0  ;;  %v1710_v17 = vadd.f32 %v1678_v37, %v1610_v59  ;;  %v1278_v51 = vmul.f32 %v3671_v56, %v3263_v48  ;;  %v1279_v63 = vmul.f32 %v3673_v3, %v3263_v48 }
 0x1b9   : > { %v1950_v10 = vmin.f32 %v1918_v39, 6.0  ;;  %v1809_v15 = vadd.f32 %v1777_v45, %v1709_v11  ;;  %v1210_v25 = vadd.f32 %v1178_v19, %v1110_v38  ;;  %v1211_v22 = vadd.f32 %v1179_v35, %v1111_v8 }
 0x1ba   : > { %v1810_v46 = vadd.f32 %v1778_v14, %v1710_v17  ;;  %v1378_v57 = vmul.f32 %v3678_v32, %v3255_v40  ;;  %v1379_v13 = vmul.f32 %v3680_v33, %v3255_v40  ;;  %v1478_v30 = vmul.f32 %v3684_v24, %v3265_v49 }
 0x1bb   : > { %v1976_v9 = vpack.c.bf16 %v1950_v10, %v1949_v55  ;;  %v1848_v61 = vmul.f32 %v3391_v23, %v1809_v15  ;;  %v1310_v62 = vadd.f32 %v1278_v51, %v1210_v25  ;;  %v1311_v60 = vadd.f32 %v1279_v63, %v1211_v22  ;;  %v3770_v63 = vld [vmem:[#allocation2 + $0xf0] sm:$0xff]  ;;  %v3774_v22 = vld [vmem:[#allocation2 + $0xf8] sm:$0xff] }
 0x1bc   : > { %v1849_v2 = vmul.f32 %v3391_v23, %v1810_v46  ;;  %v1479_v44 = vmul.f32 %v3686_v21, %v3265_v49  ;;  %v1579_v20 = vmul.f32 %v3267_v50, %v3718_v43  ;;  %v1580_v36 = vmul.f32 %v3267_v50, %v3720_v5  ;;  %v3776_v46 = vld [vmem:[#allocation2 + $0xf1] sm:$0xff] }
 0x1bd   : > { %2635 = vmatmul.mubr.bf16.gmra.mxu1 %v1976_v9  ;;  %v1887_v37 = vadd.f32 %v3402_v1, %v1848_v61  ;;  %v1410_v28 = vadd.f32 %v1378_v57, %v1310_v62  ;;  %v1411_v47 = vadd.f32 %v1379_v13, %v1311_v60  ;;  %v1679_v45 = vmul.f32 %v3257_v41, %v3728_v31  ;;  %v3782_v9 = vld [vmem:[#allocation2 + $0xf9] sm:$0xff] }
 0x1be   : > { %v1888_v14 = vadd.f32 %v3402_v1, %v1849_v2  ;;  %v1680_v27 = vmul.f32 %v3257_v41, %v3731_v52  ;;  %v1779_v29 = vmul.f32 %v3276_v58, %v3733_v54  ;;  %v1780_v6 = vmul.f32 %v3276_v58, %v3735_v4  ;;  %v3784_v61 = vld [vmem:[#allocation2 + $0xf2] sm:$0xff] }
 0x1bf   : > { %v1919_v26 = vmax.f32 %v1887_v37, 0.0  ;;  %v1510_v0 = vadd.f32 %v1478_v30, %v1410_v28  ;;  %v1511_v16 = vadd.f32 %v1479_v44, %v1411_v47  ;;  %v980_v42 = vmul.f32 %v3671_v56, %v3232_v7 }
 0x1c0   : > { %v1920_v34 = vmax.f32 %v1888_v14, 0.0  ;;  %v981_v53 = vmul.f32 %v3673_v3, %v3232_v7  ;;  %v1080_v59 = vmul.f32 %v3678_v32, %v3239_v12  ;;  %v1081_v19 = vmul.f32 %v3680_v33, %v3239_v12 }
 0x1c1   : > { %v1951_v35 = vmin.f32 %v1919_v26, 6.0  ;;  %v1611_v39 = vadd.f32 %v1579_v20, %v1510_v0  ;;  %v1612_v11 = vadd.f32 %v1580_v36, %v1511_v16  ;;  %v1180_v38 = vmul.f32 %v3684_v24, %v3244_v18  ;;  %v3790_v20 = vld [vmem:[#allocation2 + $0xfa] sm:$0xff] }
 0x1c2   : > { %v1952_v8 = vmin.f32 %v1920_v34, 6.0  ;;  %v1112_v55 = vadd.f32 %v1080_v59, %v980_v42  ;;  %v1113_v17 = vadd.f32 %v1081_v19, %v981_v53  ;;  %v1181_v56 = vmul.f32 %v3686_v21, %v3244_v18 }
 0x1c3   : > { %v1711_v51 = vadd.f32 %v1679_v45, %v1611_v39  ;;  %v1712_v3 = vadd.f32 %v1680_v27, %v1612_v11  ;;  %v1280_v32 = vmul.f32 %v3718_v43, %v3263_v48  ;;  %v1281_v33 = vmul.f32 %v3720_v5, %v3263_v48 }
 0x1c4   : > { %v1977_v10 = vpack.c.bf16 %v1952_v8, %v1951_v35  ;;  %v1212_v15 = vadd.f32 %v1180_v38, %v1112_v55  ;;  %v1213_v25 = vadd.f32 %v1181_v56, %v1113_v17  ;;  %v1380_v24 = vmul.f32 %v3728_v31, %v3255_v40 }
 0x1c5   : > { %v1811_v21 = vadd.f32 %v1779_v29, %v1711_v51  ;;  %v1812_v57 = vadd.f32 %v1780_v6, %v1712_v3  ;;  %v1381_v13 = vmul.f32 %v3731_v52, %v3255_v40  ;;  %v1480_v30 = vmul.f32 %v3733_v54, %v3265_v49 }
 0x1c6   : > { %2638 = vmatprep.mubr.bf16.mxu1 %v1977_v10  ;;  %v1312_v62 = vadd.f32 %v1280_v32, %v1212_v15  ;;  %v1313_v60 = vadd.f32 %v1281_v33, %v1213_v25  ;;  %v1481_v2 = vmul.f32 %v3735_v4, %v3265_v49  ;;  %v1581_v44 = vmul.f32 %v3267_v50, %v3770_v63  ;;  %v3822_v32 = vld [vmem:[#allocation2 + $0x108] sm:$0xff] }
 0x1c7   : > { %v1850_v36 = vmul.f32 %v3391_v23, %v1811_v21  ;;  %v1851_v37 = vmul.f32 %v3391_v23, %v1812_v57  ;;  %v1582_v28 = vmul.f32 %v3267_v50, %v3774_v22  ;;  %v1681_v47 = vmul.f32 %v3257_v41, %v3776_v46  ;;  %v3830_v25 = vld [vmem:[#allocation2 + $0x109] sm:$0xff] }
 0x1c8   : > { %v1412_v45 = vadd.f32 %v1380_v24, %v1312_v62  ;;  %v1413_v14 = vadd.f32 %v1381_v13, %v1313_v60  ;;  %v1682_v27 = vmul.f32 %v3257_v41, %v3782_v9  ;;  %v1781_v29 = vmul.f32 %v3276_v58, %v3784_v61  ;;  %v3836_v62 = vld [vmem:[#allocation2 + $0x10a] sm:$0xff]  ;;  %v3838_v60 = vld [vmem:[#allocation2 + $0x112] sm:$0xff] }
 0x1c9   : > { %v1889_v6 = vadd.f32 %v3402_v1, %v1850_v36  ;;  %v1890_v26 = vadd.f32 %v3402_v1, %v1851_v37  ;;  %v1782_v23 = vmul.f32 %v3276_v58, %v3790_v20  ;;  %v982_v0 = vmul.f32 %v3718_v43, %v3232_v7 }
 0x1ca   : > { %v1512_v16 = vadd.f32 %v1480_v30, %v1412_v45  ;;  %v1513_v42 = vadd.f32 %v1481_v2, %v1413_v14  ;;  %v983_v34 = vmul.f32 %v3720_v5, %v3232_v7  ;;  %v1082_v53 = vmul.f32 %v3728_v31, %v3239_v12  ;;  %v3834_v30 = vld [vmem:[#allocation2 + $0x111] sm:$0xff] }
 0x1cb   : > { %v1921_v59 = vmax.f32 %v1889_v6, 0.0  ;;  %v1922_v19 = vmax.f32 %v1890_v26, 0.0  ;;  %v1083_v35 = vmul.f32 %v3731_v52, %v3239_v12  ;;  %v1182_v39 = vmul.f32 %v3733_v54, %v3244_v18  ;;  %v3824_v54 = vld [vmem:[#allocation2 + $0x110] sm:$0xff] }
 0x1cc   : > { %v1613_v11 = vadd.f32 %v1581_v44, %v1512_v16  ;;  %v1614_v38 = vadd.f32 %v1582_v28, %v1513_v42  ;;  %v1114_v8 = vadd.f32 %v1082_v53, %v982_v0  ;;  %v1183_v43 = vmul.f32 %v3735_v4, %v3244_v18  ;;  %v3849_v28 = vld [vmem:[%s4338_s5] ss:$0 sm:$0xff] }
 0x1cd   : > { %v1953_v55 = vmin.f32 %v1921_v59, 6.0  ;;  %v1954_v17 = vmin.f32 %v1922_v19, 6.0  ;;  %v1115_v5 = vadd.f32 %v1083_v35, %v983_v34  ;;  %v1282_v31 = vmul.f32 %v3770_v63, %v3263_v48  ;;  %v3865_v16 = vld [vmem:[%s4339_s6] ss:$0 sm:$0xff] }
 0x1ce   : > { %v1713_v56 = vadd.f32 %v1681_v47, %v1613_v11  ;;  %v1714_v51 = vadd.f32 %v1682_v27, %v1614_v38  ;;  %v1214_v3 = vadd.f32 %v1182_v39, %v1114_v8  ;;  %v1283_v52 = vmul.f32 %v3774_v22, %v3263_v48 }
 0x1cf   : > { %v1978_v33 = vpack.c.bf16 %v1954_v17, %v1953_v55  ;;  %v1215_v10 = vadd.f32 %v1183_v43, %v1115_v5  ;;  %v1382_v4 = vmul.f32 %v3776_v46, %v3255_v40  ;;  %v1383_v15 = vmul.f32 %v3782_v9, %v3255_v40 }
 0x1d0   : > { %v1813_v24 = vadd.f32 %v1781_v29, %v1713_v56  ;;  %v1814_v21 = vadd.f32 %v1782_v23, %v1714_v51  ;;  %v1314_v57 = vadd.f32 %v1282_v31, %v1214_v3  ;;  %v1482_v13 = vmul.f32 %v3784_v61, %v3265_v49 }
 0x1d1   : > { %2639 = vmatmul.mubr.bf16.gmra.mxu1 %v1978_v33  ;;  %v1315_v2 = vadd.f32 %v1283_v52, %v1215_v10  ;;  %v1483_v44 = vmul.f32 %v3790_v20, %v3265_v49  ;;  %v1583_v36 = vmul.f32 %v3267_v50, %v3822_v32  ;;  %v1584_v37 = vmul.f32 %v3267_v50, %v3824_v54  ;;  %v3884_v52 = vld [vmem:[#allocation2 + $0x120] sm:$0xff] }
 0x1d2   : > { %v1852_v47 = vmul.f32 %v3849_v28, %v1813_v24  ;;  %v1853_v45 = vmul.f32 %v3849_v28, %v1814_v21  ;;  %v1414_v14 = vadd.f32 %v1382_v4, %v1314_v57  ;;  %v1683_v27 = vmul.f32 %v3257_v41, %v3830_v25 }
 0x1d3   : > { %v1415_v29 = vadd.f32 %v1383_v15, %v1315_v2  ;;  %v1684_v6 = vmul.f32 %v3257_v41, %v3834_v30  ;;  %v1783_v26 = vmul.f32 %v3276_v58, %v3836_v62  ;;  %v1784_v23 = vmul.f32 %v3276_v58, %v3838_v60  ;;  %v3892_v15 = vld [vmem:[#allocation2 + $0x121] sm:$0xff]  ;;  %v3896_v2 = vld [vmem:[#allocation2 + $0x129] sm:$0xff] }
 0x1d4   : > { %v1891_v0 = vadd.f32 %v3402_v1, %v1852_v47  ;;  %v1892_v42 = vadd.f32 %v3865_v16, %v1853_v45  ;;  %v1514_v34 = vadd.f32 %v1482_v13, %v1414_v14  ;;  %v984_v53 = vmul.f32 %v3770_v63, %v3232_v7 }
 0x1d5   : > { %v1515_v59 = vadd.f32 %v1483_v44, %v1415_v29  ;;  %v985_v19 = vmul.f32 %v3774_v22, %v3232_v7  ;;  %v1084_v35 = vmul.f32 %v3776_v46, %v3239_v12  ;;  %v1085_v1 = vmul.f32 %v3782_v9, %v3239_v12  ;;  %v3898_v44 = vld [vmem:[#allocation2 + $0x122] sm:$0xff] }
 0x1d6   : > { %v1923_v39 = vmax.f32 %v1891_v0, 0.0  ;;  %v1924_v11 = vmax.f32 %v1892_v42, 0.0  ;;  %v1615_v38 = vadd.f32 %v1583_v36, %v1514_v34  ;;  %v1184_v8 = vmul.f32 %v3784_v61, %v3244_v18  ;;  %v3886_v61 = vld [vmem:[#allocation2 + $0x128] sm:$0xff] }
 0x1d7   : > { %v1616_v43 = vadd.f32 %v1584_v37, %v1515_v59  ;;  %v1116_v55 = vadd.f32 %v1084_v35, %v984_v53  ;;  %v1117_v17 = vadd.f32 %v1085_v1, %v985_v19  ;;  %v1185_v63 = vmul.f32 %v3790_v20, %v3244_v18  ;;  %v3900_v36 = vld [vmem:[#allocation2 + $0x12a] sm:$0xff] }
 0x1d8   : > { %v1955_v5 = vmin.f32 %v1923_v39, 6.0  ;;  %v1956_v22 = vmin.f32 %v1924_v11, 6.0  ;;  %v1715_v31 = vadd.f32 %v1683_v27, %v1615_v38  ;;  %v1284_v46 = vmul.f32 %v3822_v32, %v3263_v48 }
 0x1d9   : > { %v1716_v56 = vadd.f32 %v1684_v6, %v1616_v43  ;;  %v1216_v9 = vadd.f32 %v1184_v8, %v1116_v55  ;;  %v1217_v51 = vadd.f32 %v1185_v63, %v1117_v17  ;;  %v1285_v3 = vmul.f32 %v3824_v54, %v3263_v48 }
 0x1da   : > { %v1979_v33 = vpack.c.bf16 %v1956_v22, %v1955_v5  ;;  %v1815_v10 = vadd.f32 %v1783_v26, %v1715_v31  ;;  %v1384_v20 = vmul.f32 %v3830_v25, %v3255_v40  ;;  %v1385_v4 = vmul.f32 %v3834_v30, %v3255_v40 }
 0x1db   : > { %v1816_v24 = vadd.f32 %v1784_v23, %v1716_v56  ;;  %v1316_v21 = vadd.f32 %v1284_v46, %v1216_v9  ;;  %v1317_v57 = vadd.f32 %v1285_v3, %v1217_v51  ;;  %v1484_v13 = vmul.f32 %v3836_v62, %v3265_v49  ;;  %v3938_v51 = vld [vmem:[#allocation2 + $0x138] sm:$0xff]  ;;  %v3940_v3 = vld [vmem:[#allocation2 + $0x140] sm:$0xff] }
 0x1dc   : > { %2642 = vmatprep.mubr.bf16.mxu1 %v1979_v33  ;;  %v1854_v37 = vmul.f32 %v3849_v28, %v1815_v10  ;;  %v1485_v47 = vmul.f32 %v3838_v60, %v3265_v49  ;;  %v1585_v45 = vmul.f32 %v3267_v50, %v3884_v52  ;;  %v1586_v14 = vmul.f32 %v3267_v50, %v3886_v61 }
 0x1dd   : > { %v1855_v27 = vmul.f32 %v3849_v28, %v1816_v24  ;;  %v1416_v29 = vadd.f32 %v1384_v20, %v1316_v21  ;;  %v1417_v6 = vadd.f32 %v1385_v4, %v1317_v57  ;;  %v1685_v26 = vmul.f32 %v3257_v41, %v3892_v15  ;;  %v3944_v4 = vld [vmem:[#allocation2 + $0x139] sm:$0xff]  ;;  %v3946_v24 = vld [vmem:[#allocation2 + $0x141] sm:$0xff] }
 0x1de   : > { %v1893_v23 = vadd.f32 %v3865_v16, %v1854_v37  ;;  %v1686_v0 = vmul.f32 %v3257_v41, %v3896_v2  ;;  %v1785_v42 = vmul.f32 %v3276_v58, %v3898_v44  ;;  %v1786_v34 = vmul.f32 %v3276_v58, %v3900_v36 }
 0x1df   : > { %v1894_v53 = vadd.f32 %v3865_v16, %v1855_v27  ;;  %v1516_v59 = vadd.f32 %v1484_v13, %v1416_v29  ;;  %v1517_v19 = vadd.f32 %v1485_v47, %v1417_v6  ;;  %v986_v35 = vmul.f32 %v3822_v32, %v3232_v7  ;;  %v3952_v47 = vld [vmem:[#allocation2 + $0x13a] sm:$0xff] }
 0x1e0   : > { %v1925_v1 = vmax.f32 %v1893_v23, 0.0  ;;  %v987_v39 = vmul.f32 %v3824_v54, %v3232_v7  ;;  %v1086_v11 = vmul.f32 %v3830_v25, %v3239_v12  ;;  %v1087_v38 = vmul.f32 %v3834_v30, %v3239_v12 }
 0x1e1   : > { %v1926_v8 = vmax.f32 %v1894_v53, 0.0  ;;  %v1617_v43 = vadd.f32 %v1585_v45, %v1516_v59  ;;  %v1618_v55 = vadd.f32 %v1586_v14, %v1517_v19  ;;  %v1186_v17 = vmul.f32 %v3836_v62, %v3244_v18  ;;  %v3954_v45 = vld [vmem:[#allocation2 + $0x142] sm:$0xff] }
 0x1e2   : > { %v1957_v63 = vmin.f32 %v1925_v1, 6.0  ;;  %v1118_v5 = vadd.f32 %v1086_v11, %v986_v35  ;;  %v1119_v22 = vadd.f32 %v1087_v38, %v987_v39  ;;  %v1187_v32 = vmul.f32 %v3838_v60, %v3244_v18 }
 0x1e3   : > { %v1958_v31 = vmin.f32 %v1926_v8, 6.0  ;;  %v1717_v54 = vadd.f32 %v1685_v26, %v1617_v43  ;;  %v1718_v46 = vadd.f32 %v1686_v0, %v1618_v55  ;;  %v1286_v25 = vmul.f32 %v3884_v52, %v3263_v48 }
 0x1e4   : > { %v1218_v56 = vadd.f32 %v1186_v17, %v1118_v5  ;;  %v1219_v30 = vadd.f32 %v1187_v32, %v1119_v22  ;;  %v1287_v9 = vmul.f32 %v3886_v61, %v3263_v48  ;;  %v1386_v62 = vmul.f32 %v3892_v15, %v3255_v40 }
 0x1e5   : > { %v1980_v33 = vpack.c.bf16 %v1958_v31, %v1957_v63  ;;  %v1817_v60 = vadd.f32 %v1785_v42, %v1717_v54  ;;  %v1818_v10 = vadd.f32 %v1786_v34, %v1718_v46  ;;  %v1387_v20 = vmul.f32 %v3896_v2, %v3255_v40 }
 0x1e6   : > { %v1318_v21 = vadd.f32 %v1286_v25, %v1218_v56  ;;  %v1319_v57 = vadd.f32 %v1287_v9, %v1219_v30  ;;  %v1486_v13 = vmul.f32 %v3898_v44, %v3265_v49  ;;  %v1487_v37 = vmul.f32 %v3900_v36, %v3265_v49  ;;  %v3988_v25 = vld [vmem:[#allocation2 + $0x150] sm:$0xff]  ;;  %v3992_v9 = vld [vmem:[#allocation2 + $0x158] sm:$0xff] }
 0x1e7   : > { %2643 = vmatmul.mubr.bf16.gmra.mxu1 %v1980_v33  ;;  %v1856_v14 = vmul.f32 %v3849_v28, %v1817_v60  ;;  %v1857_v27 = vmul.f32 %v3849_v28, %v1818_v10  ;;  %v1587_v29 = vmul.f32 %v3267_v50, %v3938_v51  ;;  %v1588_v6 = vmul.f32 %v3267_v50, %v3940_v3 }
 0x1e8   : > { %v1418_v26 = vadd.f32 %v1386_v62, %v1318_v21  ;;  %v1419_v23 = vadd.f32 %v1387_v20, %v1319_v57  ;;  %v1687_v0 = vmul.f32 %v3257_v41, %v3944_v4  ;;  %v1688_v42 = vmul.f32 %v3257_v41, %v3946_v24  ;;  %v3994_v62 = vld [vmem:[#allocation2 + $0x151] sm:$0xff]  ;;  %v4000_v21 = vld [vmem:[#allocation2 + $0x159] sm:$0xff] }
 0x1e9   : > { %v1895_v34 = vadd.f32 %v3865_v16, %v1856_v14  ;;  %v1896_v53 = vadd.f32 %v3865_v16, %v1857_v27  ;;  %v1787_v59 = vmul.f32 %v3276_v58, %v3952_v47  ;;  %v1788_v19 = vmul.f32 %v3276_v58, %v3954_v45  ;;  %v4002_v57 = vld [vmem:[#allocation2 + $0x152] sm:$0xff] }
 0x1ea   : > { %v1518_v35 = vadd.f32 %v1486_v13, %v1418_v26  ;;  %v1519_v1 = vadd.f32 %v1487_v37, %v1419_v23  ;;  %v988_v39 = vmul.f32 %v3884_v52, %v3232_v7  ;;  %v989_v11 = vmul.f32 %v3886_v61, %v3232_v7 }
 0x1eb   : > { %v1927_v38 = vmax.f32 %v1895_v34, 0.0  ;;  %v1928_v8 = vmax.f32 %v1896_v53, 0.0  ;;  %v1088_v43 = vmul.f32 %v3892_v15, %v3239_v12  ;;  %v1089_v55 = vmul.f32 %v3896_v2, %v3239_v12 }
 0x1ec   : > { %v1619_v17 = vadd.f32 %v1587_v29, %v1518_v35  ;;  %v1620_v63 = vadd.f32 %v1588_v6, %v1519_v1  ;;  %v1188_v5 = vmul.f32 %v3898_v44, %v3244_v18  ;;  %v1189_v22 = vmul.f32 %v3900_v36, %v3244_v18  ;;  %v4008_v29 = vld [vmem:[#allocation2 + $0x15a] sm:$0xff] }
 0x1ed   : > { %v1959_v52 = vmin.f32 %v1927_v38, 6.0  ;;  %v1960_v32 = vmin.f32 %v1928_v8, 6.0  ;;  %v1120_v31 = vadd.f32 %v1088_v43, %v988_v39  ;;  %v1121_v61 = vadd.f32 %v1089_v55, %v989_v11 }
 0x1ee   : > { %v1719_v54 = vadd.f32 %v1687_v0, %v1619_v17  ;;  %v1720_v46 = vadd.f32 %v1688_v42, %v1620_v63  ;;  %v1288_v15 = vmul.f32 %v3938_v51, %v3263_v48  ;;  %v1289_v2 = vmul.f32 %v3940_v3, %v3263_v48 }
 0x1ef   : > { %v1981_v56 = vpack.c.bf16 %v1960_v32, %v1959_v52  ;;  %v1220_v30 = vadd.f32 %v1188_v5, %v1120_v31  ;;  %v1221_v44 = vadd.f32 %v1189_v22, %v1121_v61  ;;  %v1388_v36 = vmul.f32 %v3944_v4, %v3255_v40 }
 0x1f0   : > { %v1819_v33 = vadd.f32 %v1787_v59, %v1719_v54  ;;  %v1820_v60 = vadd.f32 %v1788_v19, %v1720_v46  ;;  %v1389_v10 = vmul.f32 %v3946_v24, %v3255_v40  ;;  %v1488_v20 = vmul.f32 %v3952_v47, %v3265_v49 }
 0x1f1   : > { %2646 = vmatprep.mubr.bf16.mxu1 %v1981_v56  ;;  %v1320_v13 = vadd.f32 %v1288_v15, %v1220_v30  ;;  %v1321_v37 = vadd.f32 %v1289_v2, %v1221_v44  ;;  %v1489_v14 = vmul.f32 %v3954_v45, %v3265_v49  ;;  %v1589_v27 = vmul.f32 %v3267_v50, %v3988_v25  ;;  %v4040_v2 = vld [vmem:[#allocation2 + $0x168] sm:$0xff] }
 0x1f2   : > { %v1858_v6 = vmul.f32 %v3849_v28, %v1819_v33  ;;  %v1859_v26 = vmul.f32 %v3849_v28, %v1820_v60  ;;  %v1590_v23 = vmul.f32 %v3267_v50, %v3992_v9  ;;  %v1689_v0 = vmul.f32 %v3257_v41, %v3994_v62 }
 0x1f3   : > { %v1420_v42 = vadd.f32 %v1388_v36, %v1320_v13  ;;  %v1421_v34 = vadd.f32 %v1389_v10, %v1321_v37  ;;  %v1690_v53 = vmul.f32 %v3257_v41, %v4000_v21  ;;  %v1789_v59 = vmul.f32 %v3276_v58, %v4002_v57  ;;  %v4048_v36 = vld [vmem:[#allocation2 + $0x169] sm:$0xff]  ;;  %v4052_v13 = vld [vmem:[#allocation2 + $0x171] sm:$0xff] }
 0x1f4   : > { %v1897_v19 = vadd.f32 %v3865_v16, %v1858_v6  ;;  %v1898_v35 = vadd.f32 %v3865_v16, %v1859_v26  ;;  %v1790_v1 = vmul.f32 %v3276_v58, %v4008_v29  ;;  %v990_v39 = vmul.f32 %v3938_v51, %v3232_v7  ;;  %v4054_v37 = vld [vmem:[#allocation2 + $0x16a] sm:$0xff] }
 0x1f5   : > { %v1520_v11 = vadd.f32 %v1488_v20, %v1420_v42  ;;  %v1521_v38 = vadd.f32 %v1489_v14, %v1421_v34  ;;  %v991_v8 = vmul.f32 %v3940_v3, %v3232_v7  ;;  %v1090_v43 = vmul.f32 %v3944_v4, %v3239_v12  ;;  %v4056_v14 = vld [vmem:[#allocation2 + $0x172] sm:$0xff] }
 0x1f6   : > { %v1929_v55 = vmax.f32 %v1897_v19, 0.0  ;;  %v1930_v17 = vmax.f32 %v1898_v35, 0.0  ;;  %v1091_v63 = vmul.f32 %v3946_v24, %v3239_v12  ;;  %v1190_v5 = vmul.f32 %v3952_v47, %v3244_v18  ;;  %v4042_v47 = vld [vmem:[#allocation2 + $0x170] sm:$0xff] }
 0x1f7   : > { %v1621_v22 = vadd.f32 %v1589_v27, %v1520_v11  ;;  %v1622_v52 = vadd.f32 %v1590_v23, %v1521_v38  ;;  %v1122_v32 = vadd.f32 %v1090_v43, %v990_v39  ;;  %v1191_v51 = vmul.f32 %v3954_v45, %v3244_v18 }
 0x1f8   : > { %v1961_v31 = vmin.f32 %v1929_v55, 6.0  ;;  %v1962_v61 = vmin.f32 %v1930_v17, 6.0  ;;  %v1123_v3 = vadd.f32 %v1091_v63, %v991_v8  ;;  %v1290_v4 = vmul.f32 %v3988_v25, %v3263_v48 }
 0x1f9   : > { %v1721_v54 = vadd.f32 %v1689_v0, %v1621_v22  ;;  %v1722_v46 = vadd.f32 %v1690_v53, %v1622_v52  ;;  %v1222_v15 = vadd.f32 %v1190_v5, %v1122_v32  ;;  %v1291_v24 = vmul.f32 %v3992_v9, %v3263_v48 }
 0x1fa   : > { %v1982_v56 = vpack.c.bf16 %v1962_v61, %v1961_v31  ;;  %v1223_v30 = vadd.f32 %v1191_v51, %v1123_v3  ;;  %v1390_v45 = vmul.f32 %v3994_v62, %v3255_v40  ;;  %v1391_v44 = vmul.f32 %v4000_v21, %v3255_v40 }
 0x1fb   : > { %v1821_v33 = vadd.f32 %v1789_v59, %v1721_v54  ;;  %v1822_v60 = vadd.f32 %v1790_v1, %v1722_v46  ;;  %v1322_v10 = vadd.f32 %v1290_v4, %v1222_v15  ;;  %v1490_v20 = vmul.f32 %v4002_v57, %v3265_v49 }
 0x1fc   : > { %2647 = vmatmul.mubr.bf16.gmra.mxu1 %v1982_v56  ;;  %v1323_v27 = vadd.f32 %v1291_v24, %v1223_v30  ;;  %v1491_v6 = vmul.f32 %v4008_v29, %v3265_v49  ;;  %v1591_v26 = vmul.f32 %v3267_v50, %v4040_v2  ;;  %v1592_v23 = vmul.f32 %v3267_v50, %v4042_v47  ;;  %v1557_v24 = vld [vmem:[#allocation2 + $0x180] sm:$0xff] }
 0x1fd   : > { %v1860_v0 = vmul.f32 %v3849_v28, %v1821_v33  ;;  %v1861_v42 = vmul.f32 %v3849_v28, %v1822_v60  ;;  %v1422_v34 = vadd.f32 %v1390_v45, %v1322_v10  ;;  %v1691_v53 = vmul.f32 %v3257_v41, %v4048_v36  ;;  %v1558_v45 = vld [vmem:[#allocation2 + $0x188] sm:$0xff] }
 0x1fe   : > { %v1423_v59 = vadd.f32 %v1391_v44, %v1323_v27  ;;  %v1692_v19 = vmul.f32 %v3257_v41, %v4052_v13  ;;  %v1791_v35 = vmul.f32 %v3276_v58, %v4054_v37  ;;  %v1792_v1 = vmul.f32 %v3276_v58, %v4056_v14  ;;  %v1658_v27 = vld [vmem:[#allocation2 + $0x189] sm:$0xff] }
 0x1ff   : > { %v1899_v39 = vadd.f32 %v3865_v16, %v1860_v0  ;;  %v1900_v11 = vadd.f32 %v3865_v16, %v1861_v42  ;;  %v1522_v38 = vadd.f32 %v1490_v20, %v1422_v34  ;;  %v992_v8 = vmul.f32 %v3988_v25, %v3232_v7  ;;  %v1657_v20 = vld [vmem:[#allocation2 + $0x181] sm:$0xff] }
 0x200   : > { %v1523_v43 = vadd.f32 %v1491_v6, %v1423_v59  ;;  %v993_v55 = vmul.f32 %v3992_v9, %v3232_v7  ;;  %v1092_v17 = vmul.f32 %v3994_v62, %v3239_v12  ;;  %v1093_v63 = vmul.f32 %v4000_v21, %v3239_v12  ;;  %v1757_v6 = vld [vmem:[#allocation2 + $0x182] sm:$0xff] }
 0x201   : > { %v1931_v5 = vmax.f32 %v1899_v39, 0.0  ;;  %v1932_v22 = vmax.f32 %v1900_v11, 0.0  ;;  %v1623_v52 = vadd.f32 %v1591_v26, %v1522_v38  ;;  %v1192_v32 = vmul.f32 %v4002_v57, %v3244_v18 }
 0x202   : > { %v1624_v51 = vadd.f32 %v1592_v23, %v1523_v43  ;;  %v1124_v31 = vadd.f32 %v1092_v17, %v992_v8  ;;  %v1125_v61 = vadd.f32 %v1093_v63, %v993_v55  ;;  %v1193_v25 = vmul.f32 %v4008_v29, %v3244_v18  ;;  %v1758_v43 = vld [vmem:[#allocation2 + $0x18a] sm:$0xff] }
 0x203   : > { %v1963_v3 = vmin.f32 %v1931_v5, 6.0  ;;  %v1964_v9 = vmin.f32 %v1932_v22, 6.0  ;;  %v1723_v4 = vadd.f32 %v1691_v53, %v1623_v52  ;;  %v1292_v62 = vmul.f32 %v4040_v2, %v3263_v48 }
 0x204   : > { %v1724_v54 = vadd.f32 %v1692_v19, %v1624_v51  ;;  %v1224_v21 = vadd.f32 %v1192_v32, %v1124_v31  ;;  %v1225_v46 = vadd.f32 %v1193_v25, %v1125_v61  ;;  %v1293_v15 = vmul.f32 %v4042_v47, %v3263_v48 }
 0x205   : > { %v1983_v57 = vpack.c.bf16 %v1964_v9, %v1963_v3  ;;  %v1823_v56 = vadd.f32 %v1791_v35, %v1723_v4  ;;  %v1392_v30 = vmul.f32 %v4048_v36, %v3255_v40  ;;  %v1393_v29 = vmul.f32 %v4052_v13, %v3255_v40 }
 0x206   : > { %v1824_v44 = vadd.f32 %v1792_v1, %v1724_v54  ;;  %v1324_v33 = vadd.f32 %v1292_v62, %v1224_v21  ;;  %v1325_v60 = vadd.f32 %v1293_v15, %v1225_v46  ;;  %v1492_v10 = vmul.f32 %v4054_v37, %v3265_v49 }
 0x207   : > { %2650 = vmatprep.mubr.bf16.mxu1 %v1983_v57  ;;  %v1862_v26 = vmul.f32 %v3849_v28, %v1823_v56  ;;  %v1493_v23 = vmul.f32 %v4056_v14, %v3265_v49  ;;  %v1593_v0 = vmul.f32 %v3267_v50, %v1557_v24  ;;  %v1594_v59 = vmul.f32 %v3267_v50, %v1558_v45 }
 0x208   : > { %v1863_v42 = vmul.f32 %v3849_v28, %v1824_v44  ;;  %v1424_v34 = vadd.f32 %v1392_v30, %v1324_v33  ;;  %v1425_v53 = vadd.f32 %v1393_v29, %v1325_v60  ;;  %v1693_v35 = vmul.f32 %v3257_v41, %v1657_v20  ;;  %v1659_v29 = vld [vmem:[#allocation2 + $0x199] sm:$0xff] }
 0x209   : > { %v1901_v19 = vadd.f32 %v3865_v16, %v1862_v26  ;;  %v1694_v1 = vmul.f32 %v3257_v41, %v1658_v27  ;;  %v1793_v39 = vmul.f32 %v3276_v58, %v1757_v6  ;;  %v994_v55 = vmul.f32 %v4040_v2, %v3232_v7  ;;  %v2760_v33 = vld [vmem:[#allocation2] sm:$0xff] }
 0x20a   : > { %v1902_v11 = vadd.f32 %v3865_v16, %v1863_v42  ;;  %v1524_v38 = vadd.f32 %v1492_v10, %v1424_v34  ;;  %v1525_v8 = vadd.f32 %v1493_v23, %v1425_v53  ;;  %v995_v63 = vmul.f32 %v4042_v47, %v3232_v7 }
 0x20b   : > { %v1933_v17 = vmax.f32 %v1901_v19, 0.0  ;;  %v1094_v5 = vmul.f32 %v4048_v36, %v3239_v12  ;;  %v1095_v22 = vmul.f32 %v4052_v13, %v3239_v12  ;;  %v1194_v31 = vmul.f32 %v4054_v37, %v3244_v18 }
 0x20c   : > { %v1934_v52 = vmax.f32 %v1902_v11, 0.0  ;;  %v1625_v32 = vadd.f32 %v1593_v0, %v1524_v38  ;;  %v1626_v51 = vadd.f32 %v1594_v59, %v1525_v8  ;;  %v1794_v61 = vmul.f32 %v3276_v58, %v1758_v43 }
 0x20d   : > { %v1126_v25 = vadd.f32 %v1094_v5, %v994_v55  ;;  %v1127_v2 = vadd.f32 %v1095_v22, %v995_v63  ;;  %v1195_v3 = vmul.f32 %v4056_v14, %v3244_v18  ;;  %v1965_v7 = vmin.f32 %v1933_v17, 6.0 }
 0x20e   : > { %v1966_v47 = vmin.f32 %v1934_v52, 6.0  ;;  %v1725_v9 = vadd.f32 %v1693_v35, %v1625_v32  ;;  %v1726_v36 = vadd.f32 %v1694_v1, %v1626_v51  ;;  %v1294_v12 = vmul.f32 %v1557_v24, %v3263_v48  ;;  %v1660_v24 = vld [vmem:[#allocation2 + $0x1a1] sm:$0xff]  ;;  %v4144_v32 = vld [vmem:[%s4341_s8] ss:$0 sm:$0xff] }
 0x20f   : > { %v1226_v4 = vadd.f32 %v1194_v31, %v1126_v25  ;;  %v1227_v62 = vadd.f32 %v1195_v3, %v1127_v2  ;;  %v1295_v13 = vmul.f32 %v1558_v45, %v3263_v48  ;;  %v1394_v57 = vmul.f32 %v1657_v20, %v3255_v40  ;;  %v1759_v20 = vld [vmem:[#allocation2 + $0x19a] sm:$0xff] }
 0x210   : > { %v1984_v54 = vpack.c.bf16 %v1966_v47, %v1965_v7  ;;  %v1825_v21 = vadd.f32 %v1793_v39, %v1725_v9  ;;  %v1826_v37 = vadd.f32 %v1794_v61, %v1726_v36  ;;  %v1395_v56 = vmul.f32 %v1658_v27, %v3255_v40  ;;  %v1760_v27 = vld [vmem:[#allocation2 + $0x1a2] sm:$0xff] }
 0x211   : > { %v1326_v46 = vadd.f32 %v1294_v12, %v1226_v4  ;;  %v1327_v15 = vadd.f32 %v1295_v13, %v1227_v62  ;;  %v1494_v30 = vmul.f32 %v1757_v6, %v3265_v49  ;;  %v1495_v45 = vmul.f32 %v1758_v43, %v3265_v49  ;;  %v2761_v3 = vld [vmem:[%s3181_s11 + $0x10] sm:$0xff]  ;;  %v2762_v4 = vld [vmem:[%s3181_s11] sm:$0xff] }
 0x212   : > { %2651 = vmatmul.mubr.bf16.gmra.mxu1 %v1984_v54  ;;  %v1864_v18 = vmul.f32 %v3849_v28, %v1825_v21  ;;  %v1865_v14 = vmul.f32 %v3849_v28, %v1826_v37  ;;  %v1595_v60 = vmul.f32 %v2760_v33, %v3267_v50  ;;  %v1695_v0 = vmul.f32 %v3257_v41, %v1659_v29  ;;  %v2763_v54 = vld [vmem:[%s3181_s11 + $0x18] sm:$0xff] }
 0x213   : > { %v1426_v44 = vadd.f32 %v1394_v57, %v1326_v46  ;;  %v1427_v48 = vadd.f32 %v1395_v56, %v1327_v15  ;;  %v1696_v6 = vmul.f32 %v3257_v41, %v1660_v24  ;;  %v1795_v49 = vmul.f32 %v3276_v58, %v1759_v20  ;;  %v2764_v46 = vld [vmem:[%s3181_s11 + $0x8] sm:$0xff]  ;;  %v2765_v24 = vld [vmem:[%s3181_s11 + $0x30] sm:$0xff] }
 0x214   : > { %v1903_v10 = vadd.f32 %v3865_v16, %v1864_v18  ;;  %v1904_v40 = vadd.f32 %v3865_v16, %v1865_v14  ;;  %v1796_v50 = vmul.f32 %v3276_v58, %v1760_v27  ;;  %v2767_v27 = vld [vmem:[%s3181_s11 + $0x38] sm:$0xff] }
 0x215   : > { %v1526_v26 = vadd.f32 %v1494_v30, %v1426_v44  ;;  %v1527_v23 = vadd.f32 %v1495_v45, %v1427_v48 }
 0x216   : > { %v1935_v42 = vmax.f32 %v1903_v10, 0.0  ;;  %v1936_v34 = vmax.f32 %v1904_v40, 0.0 }
 0x217   : > { %v1627_v53 = vadd.f32 %v1595_v60, %v1526_v26  ;;  %v1628_v59 = vadd.f32 %v1595_v60, %v1527_v23  ;;  %v2766_v60 = vld [vmem:[%s3181_s11 + $0x20] sm:$0xff] }
 0x218   : > { %v1967_v19 = vmin.f32 %v1935_v42, 6.0  ;;  %v1968_v35 = vmin.f32 %v1936_v34, 6.0 }
 0x219   : > { %v1727_v1 = vadd.f32 %v1695_v0, %v1627_v53  ;;  %v1728_v39 = vadd.f32 %v1696_v6, %v1628_v59  ;;  %v2768_v0 = vld [vmem:[%s3181_s11 + $0x28] sm:$0xff] }
 0x21a   : > { %v1985_v11 = vpack.c.bf16 %v1968_v35, %v1967_v19  ;;  %v2769_v19 = vld [vmem:[%s3181_s11 + $0x50] sm:$0xff] }
 0x21b   : > { %v1827_v38 = vadd.f32 %v1795_v49, %v1727_v1  ;;  %v1828_v8 = vadd.f32 %v1796_v50, %v1728_v39 }
 0x21c   : > { %2654 = vmatprep.mubr.bf16.mxu1 %v1985_v11 }
 0x21d   : > { %v1866_v43 = vmul.f32 %v3849_v28, %v1827_v38  ;;  %v1867_v41 = vmul.f32 %v3849_v28, %v1828_v8  ;;  %v4149_v28 = vld [vmem:[%s4342_s9] ss:$0 sm:$0xff]  ;;  %v2770_v38 = vld [vmem:[%s3181_s11 + $0x40] sm:$0xff] }
 0x21f   : > { %v1905_v55 = vadd.f32 %v3865_v16, %v1866_v43  ;;  %v1906_v17 = vadd.f32 %v3865_v16, %v1867_v41 }
 0x221   : > { %v1937_v63 = vmax.f32 %v1905_v55, 0.0  ;;  %v1938_v5 = vmax.f32 %v1906_v17, 0.0  ;;  %v2771_v55 = vld [vmem:[%s3181_s11 + $0x58] sm:$0xff] }
 0x223   : > { %v1969_v58 = vmin.f32 %v1937_v63, 6.0  ;;  %v1970_v22 = vmin.f32 %v1938_v5, 6.0  ;;  %v2772_v5 = vld [vmem:[%s3181_s11 + $0x48] sm:$0xff] }
 0x225   : > { %v1986_v52 = vpack.c.bf16 %v1970_v22, %v1969_v58 }
 0x227   : > { %2655 = vmatmul.mubr.bf16.gmra.mxu1 %v1986_v52 }
 0x245   : > { %v2628_v51 = vpop.f32.mrf.mxu1 }
 0x246   : > { %v2221_v16 = vmul.f32 %v2628_v51, %v4144_v32 }
 0x247   : > { %v2085_v31 = vpop.f32.mrf.mxu1 }
 0x248   : > { %v2260_v61 = vadd.f32 %v4149_v28, %v2221_v16  ;;  %v2219_v25 = vmul.f32 %v4144_v32, %v2085_v31 }
 0x249   : > { %v2629_v2 = vpop.f32.mrf.mxu1 }
 0x24a   : > { %v2292_v7 = vadd.f32 %v2761_v3, %v2260_v61  ;;  %v2258_v47 = vadd.f32 %v4149_v28, %v2219_v25  ;;  %v2222_v9 = vmul.f32 %v2629_v2, %v4144_v32  ;;  %v2773_v25 = vld [vmem:[%s3181_s11 + $0x70] sm:$0xff] }
 0x24b   : > { %v2088_v36 = vpop.f32.mrf.mxu1 }
 0x24c   : > { %2324 = vst [vmem:[%s4159_s18 + $0x10] sm:$0xff] %v2292_v7  ;;  %v2290_v62 = vadd.f32 %v2762_v4, %v2258_v47  ;;  %v2261_v12 = vadd.f32 %v4149_v28, %v2222_v9  ;;  %v2220_v13 = vmul.f32 %v4144_v32, %v2088_v36  ;;  %v2774_v9 = vld [vmem:[%s3181_s11 + $0x60] sm:$0xff] }
 0x24e   : > { %2322 = vst [vmem:[%s4159_s18] sm:$0xff] %v2290_v62  ;;  %v2293_v21 = vadd.f32 %v2763_v54, %v2261_v12  ;;  %v2259_v37 = vadd.f32 %v4149_v28, %v2220_v13  ;;  %v2775_v12 = vld [vmem:[%s3181_s11 + $0x78] sm:$0xff] }
 0x250   : > { %2325 = vst [vmem:[%s4159_s18 + $0x18] sm:$0xff] %v2293_v21  ;;  %v2291_v15 = vadd.f32 %v2764_v46, %v2259_v37  ;;  %v2776_v21 = vld [vmem:[%s3181_s11 + $0x68] sm:$0xff] }
 0x252   : > { %2323 = vst [vmem:[%s4159_s18 + $0x8] sm:$0xff] %v2291_v15 }
 0x264   : > { %v2632_v57 = vpop.f32.mrf.mxu1 }
 0x265   : > { %v2225_v56 = vmul.f32 %v2632_v57, %v4144_v32 }
 0x266   : > { %v2101_v18 = vpop.f32.mrf.mxu1 }
 0x267   : > { %v2264_v14 = vadd.f32 %v4149_v28, %v2225_v56  ;;  %v2223_v30 = vmul.f32 %v4144_v32, %v2101_v18 }
 0x268   : > { %v2633_v29 = vpop.f32.mrf.mxu1 }
 0x269   : > { %v2296_v44 = vadd.f32 %v2765_v24, %v2264_v14  ;;  %v2262_v48 = vadd.f32 %v4149_v28, %v2223_v30  ;;  %v2226_v45 = vmul.f32 %v2633_v29, %v4144_v32  ;;  %v2777_v30 = vld [vmem:[%s3181_s11 + $0x90] sm:$0xff] }
 0x26a   : > { %v2104_v33 = vpop.f32.mrf.mxu1 }
 0x26b   : > { %2328 = vst [vmem:[%s4159_s18 + $0x30] sm:$0xff] %v2296_v44  ;;  %v2294_v10 = vadd.f32 %v2766_v60, %v2262_v48  ;;  %v2265_v40 = vadd.f32 %v4149_v28, %v2226_v45  ;;  %v2224_v20 = vmul.f32 %v4144_v32, %v2104_v33  ;;  %v2778_v45 = vld [vmem:[%s3181_s11 + $0x80] sm:$0xff] }
 0x26d   : > { %2326 = vst [vmem:[%s4159_s18 + $0x20] sm:$0xff] %v2294_v10  ;;  %v2297_v26 = vadd.f32 %v2767_v27, %v2265_v40  ;;  %v2263_v23 = vadd.f32 %v4149_v28, %v2224_v20  ;;  %v2779_v40 = vld [vmem:[%s3181_s11 + $0x98] sm:$0xff] }
 0x26f   : > { %2329 = vst [vmem:[%s4159_s18 + $0x38] sm:$0xff] %v2297_v26  ;;  %v2295_v6 = vadd.f32 %v2768_v0, %v2263_v23  ;;  %v2780_v26 = vld [vmem:[%s3181_s11 + $0x88] sm:$0xff] }
 0x271   : > { %2327 = vst [vmem:[%s4159_s18 + $0x28] sm:$0xff] %v2295_v6 }
 0x27d   : > { %v2636_v42 = vpop.f32.mrf.mxu1 }
 0x27e   : > { %v2229_v34 = vmul.f32 %v2636_v42, %v4144_v32 }
 0x27f   : > { %v2117_v53 = vpop.f32.mrf.mxu1 }
 0x280   : > { %v2268_v59 = vadd.f32 %v4149_v28, %v2229_v34  ;;  %v2227_v49 = vmul.f32 %v4144_v32, %v2117_v53 }
 0x281   : > { %v2637_v50 = vpop.f32.mrf.mxu1 }
 0x282   : > { %v2300_v35 = vadd.f32 %v2769_v19, %v2268_v59  ;;  %v2266_v1 = vadd.f32 %v4149_v28, %v2227_v49  ;;  %v2230_v39 = vmul.f32 %v2637_v50, %v4144_v32  ;;  %v2781_v49 = vld [vmem:[%s3181_s11 + $0xb0] sm:$0xff] }
 0x283   : > { %v2120_v11 = vpop.f32.mrf.mxu1 }
 0x284   : > { %2332 = vst [vmem:[%s4159_s18 + $0x50] sm:$0xff] %v2300_v35  ;;  %v2298_v8 = vadd.f32 %v2770_v38, %v2266_v1  ;;  %v2269_v43 = vadd.f32 %v4149_v28, %v2230_v39  ;;  %v2228_v41 = vmul.f32 %v4144_v32, %v2120_v11  ;;  %v2782_v39 = vld [vmem:[%s3181_s11 + $0xa0] sm:$0xff] }
 0x286   : > { %2330 = vst [vmem:[%s4159_s18 + $0x40] sm:$0xff] %v2298_v8  ;;  %v2301_v17 = vadd.f32 %v2771_v55, %v2269_v43  ;;  %v2267_v63 = vadd.f32 %v4149_v28, %v2228_v41  ;;  %v2783_v43 = vld [vmem:[%s3181_s11 + $0xb8] sm:$0xff] }
 0x288   : > { %2333 = vst [vmem:[%s4159_s18 + $0x58] sm:$0xff] %v2301_v17  ;;  %v2299_v58 = vadd.f32 %v2772_v5, %v2267_v63  ;;  %v2784_v17 = vld [vmem:[%s3181_s11 + $0xa8] sm:$0xff] }
 0x28a   : > { %2331 = vst [vmem:[%s4159_s18 + $0x48] sm:$0xff] %v2299_v58 }
 0x291   : > { %v2640_v22 = vpop.f32.mrf.mxu1 }
 0x292   : > { %v2233_v52 = vmul.f32 %v2640_v22, %v4144_v32 }
 0x293   : > { %v2133_v51 = vpop.f32.mrf.mxu1 }
 0x294   : > { %v2272_v16 = vadd.f32 %v4149_v28, %v2233_v52  ;;  %v2231_v31 = vmul.f32 %v4144_v32, %v2133_v51 }
 0x295   : > { %v2641_v61 = vpop.f32.mrf.mxu1 }
 0x296   : > { %v2304_v2 = vadd.f32 %v2773_v25, %v2272_v16  ;;  %v2270_v3 = vadd.f32 %v4149_v28, %v2231_v31  ;;  %v2234_v7 = vmul.f32 %v2641_v61, %v4144_v32  ;;  %v2785_v31 = vld [vmem:[%s3181_s11 + $0xd0] sm:$0xff] }
 0x297   : > { %v2136_v47 = vpop.f32.mrf.mxu1 }
 0x298   : > { %2336 = vst [vmem:[%s4159_s18 + $0x70] sm:$0xff] %v2304_v2  ;;  %v2302_v36 = vadd.f32 %v2774_v9, %v2270_v3  ;;  %v2273_v4 = vadd.f32 %v4149_v28, %v2234_v7  ;;  %v2232_v62 = vmul.f32 %v4144_v32, %v2136_v47  ;;  %v2786_v7 = vld [vmem:[%s3181_s11 + $0xc0] sm:$0xff] }
 0x29a   : > { %2334 = vst [vmem:[%s4159_s18 + $0x60] sm:$0xff] %v2302_v36  ;;  %v2305_v13 = vadd.f32 %v2775_v12, %v2273_v4  ;;  %v2271_v54 = vadd.f32 %v4149_v28, %v2232_v62  ;;  %v2787_v4 = vld [vmem:[%s3181_s11 + $0xd8] sm:$0xff] }
 0x29c   : > { %2337 = vst [vmem:[%s4159_s18 + $0x78] sm:$0xff] %v2305_v13  ;;  %v2303_v37 = vadd.f32 %v2776_v21, %v2271_v54  ;;  %v2788_v13 = vld [vmem:[%s3181_s11 + $0xc8] sm:$0xff] }
 0x29e   : > { %2335 = vst [vmem:[%s4159_s18 + $0x68] sm:$0xff] %v2303_v37 }
 0x2a7   : > { %v2644_v46 = vpop.f32.mrf.mxu1 }
 0x2a8   : > { %v2237_v15 = vmul.f32 %v2644_v46, %v4144_v32 }
 0x2a9   : > { %v2149_v57 = vpop.f32.mrf.mxu1 }
 0x2aa   : > { %v2276_v56 = vadd.f32 %v4149_v28, %v2237_v15  ;;  %v2235_v18 = vmul.f32 %v4144_v32, %v2149_v57 }
 0x2ab   : > { %v2645_v14 = vpop.f32.mrf.mxu1 }
 0x2ac   : > { %v2308_v29 = vadd.f32 %v2777_v30, %v2276_v56  ;;  %v2274_v24 = vadd.f32 %v4149_v28, %v2235_v18  ;;  %v2238_v44 = vmul.f32 %v2645_v14, %v4144_v32  ;;  %v2789_v18 = vld [vmem:[%s3181_s11 + $0xf0] sm:$0xff] }
 0x2ad   : > { %v2152_v48 = vpop.f32.mrf.mxu1 }
 0x2ae   : > { %2340 = vst [vmem:[%s4159_s18 + $0x90] sm:$0xff] %v2308_v29  ;;  %v2306_v33 = vadd.f32 %v2778_v45, %v2274_v24  ;;  %v2277_v60 = vadd.f32 %v4149_v28, %v2238_v44  ;;  %v2236_v10 = vmul.f32 %v4144_v32, %v2152_v48  ;;  %v2790_v44 = vld [vmem:[%s3181_s11 + $0xe0] sm:$0xff] }
 0x2b0   : > { %2338 = vst [vmem:[%s4159_s18 + $0x80] sm:$0xff] %v2306_v33  ;;  %v2309_v20 = vadd.f32 %v2779_v40, %v2277_v60  ;;  %v2275_v27 = vadd.f32 %v4149_v28, %v2236_v10  ;;  %v2791_v60 = vld [vmem:[%s3181_s11 + $0xf8] sm:$0xff] }
 0x2b2   : > { %2341 = vst [vmem:[%s4159_s18 + $0x98] sm:$0xff] %v2309_v20  ;;  %v2307_v23 = vadd.f32 %v2780_v26, %v2275_v27 }
 0x2b4   : > { %2339 = vst [vmem:[%s4159_s18 + $0x88] sm:$0xff] %v2307_v23 }
 0x2bc   : > { %v2648_v0 = vpop.f32.mrf.mxu1 }
 0x2bd   : > { %v2241_v6 = vmul.f32 %v2648_v0, %v4144_v32 }
 0x2be   : > { %v2165_v42 = vpop.f32.mrf.mxu1 }
 0x2bf   : > { %v2280_v34 = vadd.f32 %v4149_v28, %v2241_v6  ;;  %v2239_v53 = vmul.f32 %v4144_v32, %v2165_v42 }
 0x2c0   : > { %v2649_v59 = vpop.f32.mrf.mxu1 }
 0x2c1   : > { %v2312_v50 = vadd.f32 %v2781_v49, %v2280_v34  ;;  %v2278_v19 = vadd.f32 %v4149_v28, %v2239_v53  ;;  %v2242_v35 = vmul.f32 %v2649_v59, %v4144_v32 }
 0x2c2   : > { %v2168_v1 = vpop.f32.mrf.mxu1 }
 0x2c3   : > { %2344 = vst [vmem:[%s4159_s18 + $0xb0] sm:$0xff] %v2312_v50  ;;  %v2310_v11 = vadd.f32 %v2782_v39, %v2278_v19  ;;  %v2281_v38 = vadd.f32 %v4149_v28, %v2242_v35  ;;  %v2240_v8 = vmul.f32 %v4144_v32, %v2168_v1 }
 0x2c5   : > { %2342 = vst [vmem:[%s4159_s18 + $0xa0] sm:$0xff] %v2310_v11  ;;  %v2313_v41 = vadd.f32 %v2783_v43, %v2281_v38  ;;  %v2279_v55 = vadd.f32 %v4149_v28, %v2240_v8 }
 0x2c7   : > { %2345 = vst [vmem:[%s4159_s18 + $0xb8] sm:$0xff] %v2313_v41  ;;  %v2311_v63 = vadd.f32 %v2784_v17, %v2279_v55 }
 0x2c9   : > { %2343 = vst [vmem:[%s4159_s18 + $0xa8] sm:$0xff] %v2311_v63 }
 0x2d2   : > { %v2652_v5 = vpop.f32.mrf.mxu1 }
 0x2d3   : > { %v2245_v58 = vmul.f32 %v2652_v5, %v4144_v32 }
 0x2d4   : > { %v2181_v22 = vpop.f32.mrf.mxu1 }
 0x2d5   : > { %v2284_v52 = vadd.f32 %v4149_v28, %v2245_v58  ;;  %v2243_v51 = vmul.f32 %v4144_v32, %v2181_v22 }
 0x2d6   : > { %v2653_v16 = vpop.f32.mrf.mxu1 }
 0x2d7   : > { %v2316_v61 = vadd.f32 %v2785_v31, %v2284_v52  ;;  %v2282_v25 = vadd.f32 %v4149_v28, %v2243_v51  ;;  %v2246_v2 = vmul.f32 %v2653_v16, %v4144_v32 }
 0x2d8   : > { %v2184_v3 = vpop.f32.mrf.mxu1 }
 0x2d9   : > { %2348 = vst [vmem:[%s4159_s18 + $0xd0] sm:$0xff] %v2316_v61  ;;  %v2314_v47 = vadd.f32 %v2786_v7, %v2282_v25  ;;  %v2285_v9 = vadd.f32 %v4149_v28, %v2246_v2  ;;  %v2244_v36 = vmul.f32 %v4144_v32, %v2184_v3 }
 0x2db   : > { %2346 = vst [vmem:[%s4159_s18 + $0xc0] sm:$0xff] %v2314_v47  ;;  %v2317_v62 = vadd.f32 %v2787_v4, %v2285_v9  ;;  %v2283_v12 = vadd.f32 %v4149_v28, %v2244_v36 }
 0x2dd   : > { %2349 = vst [vmem:[%s4159_s18 + $0xd8] sm:$0xff] %v2317_v62  ;;  %v2315_v54 = vadd.f32 %v2788_v13, %v2283_v12 }
 0x2df   : > { %2347 = vst [vmem:[%s4159_s18 + $0xc8] sm:$0xff] %v2315_v54 }
 0x2e7   : > { %v2656_v21 = vpop.f32.mrf.mxu1 }
 0x2e8   : > { %v2249_v37 = vmul.f32 %v2656_v21, %v4144_v32 }
 0x2e9   : > { %v2197_v46 = vpop.f32.mrf.mxu1 }
 0x2ea   : > { %v2288_v15 = vadd.f32 %v4149_v28, %v2249_v37  ;;  %v2247_v57 = vmul.f32 %v4144_v32, %v2197_v46 }
 0x2eb   : > { %v2657_v56 = vpop.f32.mrf.mxu1 }
 0x2ec   : > { %v2320_v14 = vadd.f32 %v2789_v18, %v2288_v15  ;;  %v2286_v30 = vadd.f32 %v4149_v28, %v2247_v57  ;;  %v2250_v29 = vmul.f32 %v2657_v56, %v4144_v32 }
 0x2ed   : > { %v2200_v24 = vpop.f32.mrf.mxu1 }
 0x2ee   : > { %2352 = vst [vmem:[%s4159_s18 + $0xf0] sm:$0xff] %v2320_v14  ;;  %v2318_v48 = vadd.f32 %v2790_v44, %v2286_v30  ;;  %v2289_v45 = vadd.f32 %v4149_v28, %v2250_v29  ;;  %v2248_v33 = vmul.f32 %v4144_v32, %v2200_v24  ;;  %v2792_v32 = vld [vmem:[%s3181_s11 + $0xe8] sm:$0xff] }
 0x2f0   : > { %2350 = vst [vmem:[%s4159_s18 + $0xe0] sm:$0xff] %v2318_v48  ;;  %v2321_v10 = vadd.f32 %v2791_v60, %v2289_v45  ;;  %v2287_v40 = vadd.f32 %v4149_v28, %v2248_v33 }
 0x2f2   : > { %2353 = vst [vmem:[%s4159_s18 + $0xf8] sm:$0xff] %v2321_v10  ;;  %v2319_v20 = vadd.f32 %v2792_v32, %v2287_v40 }
 0x2f4   : > { %2351 = vst [vmem:[%s4159_s18 + $0xe8] sm:$0xff] %v2319_v20 }
 0x2f5   : > { %2912 = shalt.err (!%p2909_p9)
}
 0x2f6   : > { %s2913_s11 = scalar_lea.hbm %s4285_s23, 4096  ;;  %s2917_s29 = scalar_lea.hbm %s4343_s10, 8192 }
 0x2f7   : > { %p2914_p1 = scmp.ne.s32.totalorder %s4285_s23, %s2913_s11  ;;  %p2918_p11 = scmp.lt.s32.totalorder %s4285_s23, %s4343_s10 }
 0x2f8   : > { %p2919_p13 = scmp.lt.s32.totalorder %s2917_s29, %s2913_s11 }
 0x2f9   : > { %p2915_p8 = pnand %p2914_p1, %p4368_p6 }
 0x2fa   : > { %p2920_p2 = por %p2919_p13, %p2918_p11 }
 0x2fb   : > { %p2916_p10 = pneg %p2915_p8 }
 0x2fd   : > { %p2921_p4 = pnand %p2920_p2, %p2916_p10 }
 0x2ff   : > { %2924 = shalt.err (!%p2921_p4)
}
 0x300   : > { %s2983_s12 = smov 128   ;;  %s2984_s27 = smov 8  }
 0x301   : > { %2672 = dma.vmem_to_hbm [thread:$0]  (%p4368_p6), %s4287_s24, 4096, %s4285_s23, %s2355_s17, %s2983_s12, %s2983_s12, %s2984_s27  }
 0x302 PF: > { %s2383_s4 = sand.u32 1, %s2959_s13   ;;  %p4369_p12 = scmp.ne.s32.totalorder %s4352_s20, 0 }
 0x303   : > { %p4370_p0 = scmp.ge.s32.totalorder %s2971_s16, 2  ;;  %s2384_s30 = scalar_lea.sflag [#allocation5], %s2383_s4 }
 0x305   : > { %p2689_p5 = pnand %p4370_p0, %p4369_p12 }
 0x307   : > { %p2690_p3 = pneg %p2689_p5 }
 0x309   : > { %2954 = dma.done.wait (%p2690_p3), %s2384_s30, 4096  }
 0x30a   : > { %2956 = vsyncadd (%p2690_p3), %s2384_s30, 4294963200  ;;  %s4371_s28 = sld [smem:[#allocation16_spill]]  ;;  %p25_p7 = scmp.ge.s32.totalorder %s3120_s26, 4  }
 0x30b   : > { %s4372_s13 = smov %s2963_s14  ;;  %s4373_s14 = smov %s2967_s15 }
 0x30c   : > { %s4375_s16 = smov %s3120_s26  ;;  %27 = sbr.rel (!%p25_p7) target bundleno = 11 (0xb), region = 119 }
 0x310   : > { %s4374_s15 = smov %s4371_s28 }
 0x311   :  { %2389 = vsyncpa [#allocation4], 1 }
 0x312   :  { %2391 = vsyncpa [#allocation4 + $0x1], 1 }
 0x313   :  { %2392 = vsyncpa [#allocation7], 1 }
 0x314   :  { %2393 = vsyncpa [#allocation10], 1 }
 0x315   :  { %2394 = vsyncpa [#allocation5], 1 }
 0x316   :  { %2396 = vsyncpa [#allocation5 + $0x1], 1 }

</bundles_post_ra>
